<compile_context>
chip_gen: v5e
topology: v5e:2x2
jax: 0.10.0
libtpu: 0.0.40
codegen_flags: <defaults>
</compile_context>

<pallas_src>
import functools
import math

import jax
import jax.numpy as jnp
import numpy as np
from jax.experimental import pallas as pl
from jax.experimental.pallas import tpu as pltpu

DT_ACT = jnp.bfloat16   # HBM storage dtype of intermediate activations
DT_W = jnp.bfloat16     # conv / resample matrix dtype; accumulation stays f32

LATENT_LEVELS = 5
RESOLUTION_LEVELS = 7
LVL_DIFF = RESOLUTION_LEVELS - LATENT_LEVELS


# ---------------------------------------------------------------------------
# Weight / resampling-matrix pre-processing (numpy, once at init)
# ---------------------------------------------------------------------------
def _toeplitz_conv(w, W):
    """w: (K,K,Cin,Cout) -> T: (K, W*Cin, W*Cout): 'same' conv as
       y[h] = sum_dy x_hpad[h+dy] @ T[dy] with lane-fused rows (w*Cin+ci)."""
    K, _, Cin, Cout = w.shape
    pad = K // 2
    T = np.zeros((K, W * Cin, W * Cout), np.float32)
    for dy in range(K):
        for dx in range(K):
            for wo in range(W):
                wi = wo + dx - pad
                if 0 <= wi < W:
                    T[dy, wi * Cin:(wi + 1) * Cin,
                      wo * Cout:(wo + 1) * Cout] = w[dy, dx]
    return T


def _bilinear_up2_matrix(n):
    """(2n, n) torch bilinear 2x upsample, align_corners=True."""
    out = 2 * n
    if n == 1:
        return np.ones((out, 1), np.float32)
    U = np.zeros((out, n), np.float32)
    pos = np.arange(out, dtype=np.float64) * (n - 1) / (out - 1)
    lo = np.clip(np.floor(pos).astype(np.int64), 0, n - 2)
    frac = (pos - lo).astype(np.float32)
    U[np.arange(out), lo] = 1.0 - frac
    U[np.arange(out), lo + 1] = frac
    return U


def _avgpool2_matrix(n):
    U = np.zeros((n // 2, n), np.float32)
    idx = np.arange(n // 2)
    U[idx, 2 * idx] = 0.5
    U[idx, 2 * idx + 1] = 0.5
    return U


def _nearest_matrix(n_out, n_in):
    M = np.zeros((n_out, n_in), np.float32)
    src = (np.arange(n_out) * n_in) // n_out
    M[np.arange(n_out), src] = 1.0
    return M


def _lane_expand(U, C):
    """Width map U (n_out, n_in) -> lane-fused map M (n_in*C, n_out*C)."""
    n_out, n_in = U.shape
    M = np.zeros((n_in * C, n_out * C), np.float32)
    eye = np.eye(C, dtype=np.float32)
    for wo in range(n_out):
        for wi in range(n_in):
            if U[wo, wi] != 0.0:
                M[wi * C:(wi + 1) * C, wo * C:(wo + 1) * C] = U[wo, wi] * eye
    return M


class ParamGen:
    def __init__(self, seed):
        self.rng = np.random.default_rng(seed)

    def conv(self, k, cin, cout):
        scale = 1.0 / math.sqrt(k * k * cin)
        w = (self.rng.standard_normal((k, k, cin, cout)) * scale).astype(np.float32)
        b = np.zeros((cout,), np.float32)
        return w, b


# ---------------------------------------------------------------------------
# Chain program builder: static (hashable) spec + runtime arrays
# ---------------------------------------------------------------------------
class ChainBuilder:
    """Builds one fused Pallas kernel as a linear program of ops over a current
       lane-dense (H, W*C) value: load / conv (w/ fused concat) / resample /
       save / loadsaved / reparam / output."""

    def __init__(self, B):
        self.B = B
        self.inputs = []      # (H, W, C, tag)
        self.outputs = []     # (H, W, C, tag)
        self.ops = []
        self.args = []
        self.saved_shapes = {}
        self.H = self.W = self.C = None

    def add_input(self, H, W, C, tag="bf16"):
        self.inputs.append((H, W, C, tag))
        return len(self.inputs) - 1

    def load(self, idx):
        H, W, C, _ = self.inputs[idx]
        self.ops.append(("load", idx, H, W, C))
        self.H, self.W, self.C = H, W, C

    def load_saved(self, name):
        H, W, C = self.saved_shapes[name]
        self.ops.append(("loadsaved", name))
        self.H, self.W, self.C = H, W, C

    def save(self, name):
        self.saved_shapes[name] = (self.H, self.W, self.C)
        self.ops.append(("save", name))

    def output(self, tag="bf16"):
        oi = len(self.outputs)
        self.outputs.append((self.H, self.W, self.C, tag))
        self.ops.append(("output", oi, tag))

    def resample(self, kind, target=None):
        H, W, C = self.H, self.W, self.C
        if kind == "pool2":
            UH, UW = _avgpool2_matrix(H), _avgpool2_matrix(W)
            Hn, Wn = H // 2, W // 2
        elif kind == "up2":
            UH, UW = _bilinear_up2_matrix(H), _bilinear_up2_matrix(W)
            Hn, Wn = 2 * H, 2 * W
        elif kind == "nearest":
            Hn, Wn = target
            UH, UW = _nearest_matrix(Hn, H), _nearest_matrix(Wn, W)
        else:
            raise ValueError(kind)
        if H > 1:
            self.args.append(jnp.asarray(UH, DT_W))           # bf16 resample mats
        self.args.append(jnp.asarray(_lane_expand(UW, C), DT_W))
        self.ops.append(("resample", H, W, Hn, Wn, C))
        self.H, self.W = Hn, Wn

    def conv(self, w, bias, act="relu", merge=None):
        w = np.asarray(w, np.float32)
        bias = np.asarray(bias, np.float32)
        K, cout = w.shape[0], w.shape[3]
        H, W = self.H, self.W
        mg = None
        if merge is None:
            assert w.shape[2] == self.C, (w.shape, self.C)
            wp = w
        else:
            kind, key, sec_first = merge
            if kind == "input":
                Hs, Ws, Cs, _ = self.inputs[key]
            else:
                Hs, Ws, Cs = self.saved_shapes[key]
            assert Hs == H and Ws == W, (Hs, Ws, H, W)
            assert w.shape[2] == self.C + Cs
            if sec_first:
                w_sec, wp = w[:, :, :Cs, :], w[:, :, Cs:, :]
            else:
                wp, w_sec = w[:, :, :self.C, :], w[:, :, self.C:, :]
            mg = (kind, key, Cs)
        if act == "musig":
            assert cout == 4
        self.args.append(jnp.asarray(_toeplitz_conv(wp, W), DT_W))
        self.args.append(jnp.asarray(np.tile(bias, W)[None, :], jnp.float32))
        if mg is not None:
            self.args.append(jnp.asarray(_toeplitz_conv(w_sec, W), DT_W))
        self.ops.append(("conv", K, self.C, cout, H, W, act, mg))
        self.C = cout

    def reparam(self, eps_idx):
        W = self.W
        assert self.C == 4
        Smu = np.zeros((W * 4, W * 2), np.float32)
        Ssg = np.zeros((W * 4, W * 2), np.float32)
        for wi in range(W):
            for c in range(2):
                Smu[wi * 4 + c, wi * 2 + c] = 1.0
                Ssg[wi * 4 + 2 + c, wi * 2 + c] = 1.0
        self.args.append(jnp.asarray(Smu, jnp.float32))
        self.args.append(jnp.asarray(Ssg, jnp.float32))
        self.ops.append(("reparam", eps_idx, self.H, W))
        self.C = 2

    def build(self):
        spec = (self.B, tuple(self.inputs), tuple(self.ops), tuple(self.outputs))
        return spec, tuple(self.args)


# ---------------------------------------------------------------------------
# Pallas kernel factory (cached per static spec)
# ---------------------------------------------------------------------------
@functools.lru_cache(maxsize=None)
def _get_chain_call(spec):
    B, inputs, ops, outputs = spec

    in_specs = []
    est_bytes = 0
    for (H, W, C, tag) in inputs:
        in_specs.append(pl.BlockSpec((None, H, W * C), lambda b: (b, 0, 0)))
        est_bytes += H * W * C * (4 if tag == "f32" else 2)

    ridx = len(inputs)
    plan = []
    buf_rows, buf_cols = 0, 0

    def add_spec(shape, itemsize):
        nonlocal ridx, est_bytes
        if len(shape) == 2:
            in_specs.append(pl.BlockSpec(shape, lambda b: (0, 0)))
        else:
            in_specs.append(pl.BlockSpec(shape, lambda b: (0, 0, 0)))
        est_bytes += int(np.prod(shape)) * itemsize
        ridx += 1
        return ridx - 1

    for op in ops:
        d = {}
        if op[0] == "resample":
            _, h_src, w_src, Hn, Wn, C = op
            if h_src > 1:
                d["uh"] = add_spec((Hn, h_src), 2)
            d["mw"] = add_spec((w_src * C, Wn * C), 2)
        elif op[0] == "conv":
            _, K, Cin, Cout, H, W, act, mg = op
            d["t"] = add_spec((K, W * Cin, W * Cout), 2)
            d["b"] = add_spec((1, W * Cout), 4)
            if mg is not None:
                Cs = mg[2]
                d["ts"] = add_spec((K, W * Cs, W * Cout), 2)
                if K == 3:
                    buf_rows = max(buf_rows, H + 2)
                    buf_cols = max(buf_cols, W * Cs)
            if K == 3:
                buf_rows = max(buf_rows, H + 2)
                buf_cols = max(buf_cols, W * Cin)
        elif op[0] == "reparam":
            _, eps_idx, H, W = op
            d["smu"] = add_spec((W * 4, W * 2), 4)
            d["ssg"] = add_spec((W * 4, W * 2), 4)
        plan.append(d)

    n_in = ridx
    out_specs = []
    out_shapes = []
    for (H, W, C, tag) in outputs:
        dt = jnp.float32 if tag == "f32" else DT_ACT
        out_specs.append(pl.BlockSpec((None, H, W * C), lambda b: (b, 0, 0)))
        out_shapes.append(jax.ShapeDtypeStruct((B, H, W * C), dt))
        est_bytes += H * W * C * (4 if tag == "f32" else 2)
    n_out = len(outputs)

    scratch = []
    if buf_rows:
        # one shared H-padding buffer per kernel, reused by every 3x3 conv
        scratch.append(pltpu.VMEM((buf_rows, buf_cols), jnp.float32))

    def kernel(*refs):
        ins = refs[:n_in]
        outs = refs[n_in:n_in + n_out]
        scr = refs[n_in + n_out:]
        buf = scr[0] if scr else None
        saved = {}
        cur = None

        def conv3x3(val, Hc, wc_in, t_ref):
            zrow = jnp.zeros((1, wc_in), jnp.float32)
            buf[0:1, 0:wc_in] = zrow
            buf[Hc + 1:Hc + 2, 0:wc_in] = zrow
            buf[1:Hc + 1, 0:wc_in] = val
            parts = [jnp.dot(buf[dy:dy + Hc, 0:wc_in].astype(DT_W), t_ref[dy],
                             preferred_element_type=jnp.float32)
                     for dy in range(3)]
            return parts[0] + parts[1] + parts[2]   # chained dot sum (bias later)

        for op, d in zip(ops, plan):
            tag0 = op[0]
            if tag0 == "load":
                _, idx, H, W, C = op
                cur = ins[idx][...].astype(jnp.float32)
            elif tag0 == "loadsaved":
                cur = saved[op[1]]
            elif tag0 == "save":
                saved[op[1]] = cur
            elif tag0 == "output":
                _, oi, otag = op
                dt = jnp.float32 if otag == "f32" else DT_ACT
                outs[oi][...] = cur.astype(dt)
            elif tag0 == "resample":
                _, h_src, w_src, Hn, Wn, C = op
                if h_src == 1:                 # degenerate align-corners / nearest
                    cur = jnp.broadcast_to(cur, (Hn, w_src * C))
                else:
                    cur = jnp.dot(ins[d["uh"]][...], cur.astype(DT_W),
                                  preferred_element_type=jnp.float32)
                cur = jnp.dot(cur.astype(DT_W), ins[d["mw"]][...],
                              preferred_element_type=jnp.float32)
            elif tag0 == "reparam":            # z = mu + softplus(sigma) * eps
                _, eps_idx, H, W = op
                eps = ins[eps_idx][...].astype(jnp.float32)
                mu = jnp.dot(cur, ins[d["smu"]][...],
                             preferred_element_type=jnp.float32)
                sg = jnp.dot(cur, ins[d["ssg"]][...],
                             preferred_element_type=jnp.float32)
                cur = mu + sg * eps
            elif tag0 == "conv":
                _, K, Cin, Cout, H, W, act, mg = op
                t_ref = ins[d["t"]]
                if K == 3:
                    acc = conv3x3(cur, H, W * Cin, t_ref)
                else:
                    acc = jnp.dot(cur.astype(DT_W), t_ref[0],
                                  preferred_element_type=jnp.float32)
                if mg is not None:             # fused concat->conv
                    kind, key, Cs = mg
                    sec = (ins[key][...].astype(jnp.float32)
                           if kind == "input" else saved[key])
                    ts_ref = ins[d["ts"]]
                    if K == 3:
                        acc = acc + conv3x3(sec, H, W * Cs, ts_ref)
                    else:
                        acc = acc + jnp.dot(sec.astype(DT_W), ts_ref[0],
                                            preferred_element_type=jnp.float32)
                acc = acc + ins[d["b"]][...]   # bias added once
                if act == "relu":
                    cur = jnp.maximum(acc, 0.0)
                elif act == "musig":           # mu|sigma head: softplus lanes 2,3
                    lane = jax.lax.broadcasted_iota(jnp.int32, acc.shape, 1)
                    sp = (jnp.log(1.0 + jnp.exp(-jnp.abs(acc)))
                          + jnp.maximum(acc, 0.0))
                    cur = jnp.where((lane & 3) >= 2, sp, acc)
                else:
                    cur = acc
            else:
                raise ValueError(tag0)

    # size the VMEM request to the real footprint (double-buffered) + margin
    vmem_limit = int(min(48 * 2**20, max(24 * 2**20, 2 * est_bytes + 12 * 2**20)))
    return pl.pallas_call(
        kernel,
        out_shape=tuple(out_shapes),
        grid=(B,),
        in_specs=in_specs,
        out_specs=tuple(out_specs),
        scratch_shapes=scratch,
        compiler_params=pltpu.CompilerParams(
            dimension_semantics=("parallel",),
            vmem_limit_bytes=vmem_limit),
    )


def apply_chain(spec, args, tensor_inputs):
    fn = _get_chain_call(spec)
    out = fn(*tensor_inputs, *args)
    return list(out) if isinstance(out, (tuple, list)) else [out]


# ---------------------------------------------------------------------------
# Model construction (weights -> fused chain specs/args)
# ---------------------------------------------------------------------------
def init_phiseg(seed, B, H, W, input_channels, num_classes, nf):
    pg = ParamGen(seed)
    L, R, LD = LATENT_LEVELS, RESOLUTION_LEVELS, LVL_DIFF
    S = [H >> i for i in range(R)]
    assert S[R - 1] >= 1 and H == W

    def build_contracting(cin0):
        b = ChainBuilder(B)
        xin = b.add_input(S[0], S[0], cin0)
        b.load(xin)
        prev = cin0
        for i in range(R):
            if i > 0:
                b.resample("pool2")
            for j in range(3):
                cin = prev if j == 0 else nf[i]
                w_, bi = pg.conv(3, cin, nf[i])
                b.conv(w_, bi, "relu")
            prev = nf[i]
            if R - L <= i <= R - 2:
                b.output("bf16")        # bridge taps blocks[2..5]
        b.output("bf16")                # deepest features (H=1)
        return b.build()

    def gen_samplez_weights():
        levels = []
        c = nf[R - 1]
        lvl = [pg.conv(3, c, c), pg.conv(3, c, c)]
        wm, bm = pg.conv(1, c, 2)
        ws_, bs_ = pg.conv(1, c, 2)
        lvl.append((np.concatenate([wm, ws_], 3), np.concatenate([bm, bs_])))
        levels.append(lvl)
        upc = nf[0] * 2
        for k in range(1, L):
            cc = upc + nf[R - 1 - k]
            lvl = [pg.conv(3, 2, upc), pg.conv(3, upc, upc),
                   pg.conv(3, cc, cc), pg.conv(3, cc, cc)]
            wm, bm = pg.conv(1, cc, 2)
            ws_, bs_ = pg.conv(1, cc, 2)
            lvl.append((np.concatenate([wm, ws_], 3), np.concatenate([bm, bs_])))
            levels.append(lvl)
        return levels

    def build_samplez(weights, sampling):
        b = ChainBuilder(B)
        pre = b.add_input(S[R - 1], S[R - 1], nf[R - 1])
        bridges = [b.add_input(S[R - 1 - k], S[R - 1 - k], nf[R - 1 - k])
                   for k in range(1, L)]
        n_noise = L if sampling else L - 1
        noise = [b.add_input(S[R - 1 - k], S[R - 1 - k], 2,
                             tag="f32" if sampling else "bf16")
                 for k in range(n_noise)]
        b.load(pre)
        for k in range(L):
            lvl = weights[k]
            if k == 0:
                b.conv(*lvl[0], act="relu")
                b.conv(*lvl[1], act="relu")
                b.conv(*lvl[2], act="musig")
            else:
                b.resample("up2")
                b.conv(*lvl[0], act="relu")
                b.conv(*lvl[1], act="relu")
                b.conv(*lvl[2], act="relu",
                       merge=("input", bridges[k - 1], False))
                b.conv(*lvl[3], act="relu")
                b.conv(*lvl[4], act="musig")
            b.output("f32")                    # head: [mu(2) | softplus-sigma(2)]
            if sampling:
                b.reparam(noise[k])            # fused z = mu + sigma*eps
                b.output("bf16")
            elif k < L - 1:
                b.load(noise[k])               # training prior: z := posterior z
        return b.build()

    def build_likelihood():
        b = ChainBuilder(B)
        zin = [b.add_input(S[R - 1 - k], S[R - 1 - k], 2) for k in range(L)]
        for k in range(L):
            c = nf[L - 1 - k]
            b.load(zin[k])
            w1, b1 = pg.conv(3, 2, c)
            b.conv(w1, b1, "relu")
            w2, b2 = pg.conv(3, c, c)
            b.conv(w2, b2, "relu")
            for _ in range(LD):
                b.resample("up2")
                wt, bt = pg.conv(3, c, c)
                b.conv(wt, bt, "relu")
            b.save("pz%d" % (L - 1 - k))
        level_order = []

        def s_head(level):
            wl, bl = pg.conv(1, b.C, num_classes)
            b.conv(wl, bl, "none")
            if b.H != S[0]:
                b.resample("nearest", target=(S[0], S[0]))   # fused nearest resize
            b.output("f32")
            level_order.append(level)

        b.load_saved("pz%d" % (L - 1))
        b.save("pc%d" % (L - 1))
        s_head(L - 1)
        for i in reversed(range(L - 1)):
            b.load_saved("pc%d" % (i + 1))
            cin_p = b.C
            cin_s = nf[i]
            cout = nf[i + LD]
            b.resample("up2")
            w1, b1 = pg.conv(3, cin_s + cin_p, cout)
            b.conv(w1, b1, "relu", merge=("saved", "pz%d" % i, True))
            w2, b2 = pg.conv(3, cout, cout)
            b.conv(w2, b2, "relu")
            b.save("pc%d" % i)
            s_head(i)
        spec, args = b.build()
        return spec, args, tuple(level_order)

    post_con_s, post_con_a = build_contracting(input_channels + 2)
    post_w = gen_samplez_weights()
    post_sz_s, post_sz_a = build_samplez(post_w, sampling=True)
    pri_con_s, pri_con_a = build_contracting(input_channels)
    pri_w = gen_samplez_weights()
    pri_sz_ovr_s, pri_sz_ovr_a = build_samplez(pri_w, sampling=False)
    pri_sz_smp_s, pri_sz_smp_a = build_samplez(pri_w, sampling=True)
    lik_s, lik_a, lik_levels = build_likelihood()

    static = {"num_classes": num_classes, "H": H, "W": W,
              "post_con": post_con_s, "post_sz": post_sz_s,
              "pri_con": pri_con_s, "pri_sz_ovr": pri_sz_ovr_s,
              "pri_sz_smp": pri_sz_smp_s, "lik": lik_s,
              "lik_levels": lik_levels}
    arrays = {"post_con": post_con_a, "post_sz": post_sz_a,
              "pri_con": pri_con_a, "pri_sz_ovr": pri_sz_ovr_a,
              "pri_sz_smp": pri_sz_smp_a, "lik": lik_a}
    return static, arrays


# ---------------------------------------------------------------------------
# Forward pass (5 fused pallas_calls in training mode)
# ---------------------------------------------------------------------------
def phiseg_forward(static, arrays, patch_nchw, mask, rng, *, training=True):
    L, R = LATENT_LEVELS, RESOLUTION_LEVELS
    nc = static["num_classes"]
    B = patch_nchw.shape[0]
    x = jnp.transpose(patch_nchw, (0, 2, 3, 1)).astype(jnp.float32)   # NHWC
    H, W = x.shape[1], x.shape[2]
    S = [H >> i for i in range(R)]
    onehot = jax.nn.one_hot(mask, 2, dtype=jnp.float32) - 0.5
    x_post = jnp.concatenate([x, onehot], axis=-1).reshape(B, H, -1).astype(DT_ACT)
    x_pri = x.reshape(B, H, -1).astype(DT_ACT)
    rng_post, rng_pri = jax.random.split(rng)

    def make_eps(key):
        return [jax.random.normal(jax.random.fold_in(key, k),
                                  (B, S[R - 1 - k], S[R - 1 - k], 2), jnp.float32
                                  ).reshape(B, S[R - 1 - k], S[R - 1 - k] * 2)
                for k in range(L)]

    def encoder(con_s, con_a, sz_s, sz_a, x_in, extra):
        con_out = apply_chain(con_s, con_a, [x_in])
        bridges = con_out[:-1]                 # [blocks2, blocks3, blocks4, blocks5]
        pre = con_out[-1]
        return apply_chain(sz_s, sz_a, [pre] + bridges[::-1] + list(extra))

    post_out = encoder(static["post_con"], arrays["post_con"],
                       static["post_sz"], arrays["post_sz"],
                       x_post, make_eps(rng_post))
    heads_post = post_out[0::2]
    z_post = post_out[1::2]

    if training:
        heads_pri = encoder(static["pri_con"], arrays["pri_con"],
                            static["pri_sz_ovr"], arrays["pri_sz_ovr"],
                            x_pri, list(z_post[:L - 1]))
        z_lik = list(z_post)
    else:
        pri_out = encoder(static["pri_con"], arrays["pri_con"],
                          static["pri_sz_smp"], arrays["pri_sz_smp"],
                          x_pri, make_eps(rng_pri))
        heads_pri = pri_out[0::2]
        z_lik = list(pri_out[1::2])

    s_raw = apply_chain(static["lik"], arrays["lik"], z_lik)
    s_list = [None] * L
    for idx, lev in enumerate(static["lik_levels"]):
        slab = s_raw[idx].reshape(B, H, W, nc)
        s_list[lev] = jnp.transpose(slab, (0, 3, 1, 2))        # NCHW

    def split_heads(heads):
        mu, sg = [None] * L, [None] * L
        for k in range(L):
            hk = heads[k]
            Hk = hk.shape[1]
            h4 = hk.reshape(B, Hk, Hk, 4)
            mu[L - 1 - k] = jnp.transpose(h4[..., 0:2], (0, 3, 1, 2))
            sg[L - 1 - k] = jnp.transpose(h4[..., 2:4], (0, 3, 1, 2))
        return mu, sg

    mu_post, sig_post = split_heads(heads_post)
    mu_pri, sig_pri = split_heads(heads_pri)
    aux = {"posterior_mu": mu_post, "posterior_sigma": sig_post,
           "prior_mu": mu_pri, "prior_sigma": sig_pri}
    return s_list, aux


# ---------------------------------------------------------------------------
# Self-test: fused chain kernel vs plain-JAX reference
# ---------------------------------------------------------------------------
def _ref_up2(x):
    def interp(arr, axis, n):
        out_n = 2 * n
        if n == 1:
            return jnp.repeat(arr, out_n, axis=axis)
        pos = jnp.arange(out_n, dtype=jnp.float32) * ((n - 1) / (out_n - 1))
        lo = jnp.clip(jnp.floor(pos).astype(jnp.int32), 0, n - 2)
        frac = pos - lo.astype(jnp.float32)
        a = jnp.take(arr, lo, axis=axis)
        b = jnp.take(arr, lo + 1, axis=axis)
        sh = [1] * arr.ndim
        sh[axis] = out_n
        return a * (1.0 - frac.reshape(sh)) + b * frac.reshape(sh)
    _, Hh, Ww, _ = x.shape
    return interp(interp(x, 1, Hh), 2, Ww)


def _self_test():
    rng = np.random.default_rng(0)
    B, Hh, Ww, Cin, Csec = 2, 8, 8, 3, 5

    def bf(a):
        return np.asarray(jnp.asarray(a, jnp.bfloat16).astype(jnp.float32))

    x = bf(rng.standard_normal((B, Hh, Ww, Cin)).astype(np.float32))
    sec = bf(rng.standard_normal((B, Hh // 2, Ww // 2, Csec)).astype(np.float32))
    eps = rng.standard_normal((B, Hh, Ww, 2)).astype(np.float32)

    def mk(k, cin, cout):
        w = bf((rng.standard_normal((k, k, cin, cout)) /
                math.sqrt(k * k * cin)).astype(np.float32))
        b = (rng.standard_normal((cout,)) * 0.1).astype(np.float32)
        return w, b

    w0, b0 = mk(3, Cin, 6)
    w1, b1 = mk(3, 6 + Csec, 7)       # merge from input, primary first
    w2, b2 = mk(3, 6 + 7, 8)          # merge from saved, secondary first
    w3, b3 = mk(1, 8, 4)
    w4, b4 = mk(1, 2, 3)

    cb = ChainBuilder(B)
    xin = cb.add_input(Hh, Ww, Cin)
    sin = cb.add_input(Hh // 2, Ww // 2, Csec)
    ein = cb.add_input(Hh, Ww, 2, tag="f32")
    cb.load(xin)
    cb.conv(w0, b0, "relu")
    cb.save("skip")
    cb.resample("pool2")
    cb.conv(w1, b1, "relu", merge=("input", sin, False))
    cb.resample("up2")
    cb.conv(w2, b2, "relu", merge=("saved", "skip", True))
    cb.output("bf16")
    cb.conv(w3, b3, "musig")
    cb.output("f32")
    cb.reparam(ein)
    cb.output("bf16")
    cb.conv(w4, b4, "none")
    cb.resample("nearest", target=(2 * Hh, 2 * Ww))
    cb.output("f32")
    spec, args = cb.build()

    outs = apply_chain(spec, args,
                       [jnp.asarray(x.reshape(B, Hh, Ww * Cin), DT_ACT),
                        jnp.asarray(sec.reshape(B, Hh // 2, (Ww // 2) * Csec), DT_ACT),
                        jnp.asarray(eps.reshape(B, Hh, Ww * 2), jnp.float32)])
    tap, head, z, out = [np.asarray(o, np.float32) for o in outs]

    def conv(a, w_, b_):
        y = jax.lax.conv_general_dilated(
            a, w_, window_strides=(1, 1), padding="SAME",
            dimension_numbers=("NHWC", "HWIO", "NHWC"))
        return y + b_

    xr = jnp.asarray(x)
    r = jax.nn.relu(conv(xr, jnp.asarray(w0), jnp.asarray(b0)))
    skip = r
    r = r.reshape(B, Hh // 2, 2, Ww // 2, 2, 6).mean(axis=(2, 4))
    r = jnp.concatenate([r, jnp.asarray(sec)], axis=-1)
    r = jax.nn.relu(conv(r, jnp.asarray(w1), jnp.asarray(b1)))
    r = _ref_up2(r)
    r = jnp.concatenate([skip, r], axis=-1)
    r = jax.nn.relu(conv(r, jnp.asarray(w2), jnp.asarray(b2)))
    tap_ref = r
    hd = conv(r, jnp.asarray(w3), jnp.asarray(b3))
    head_ref = jnp.concatenate([hd[..., :2], jnp.logaddexp(hd[..., 2:], 0.0)], -1)
    z_ref = head_ref[..., :2] + head_ref[..., 2:] * jnp.asarray(eps)
    o = conv(z_ref, jnp.asarray(w4), jnp.asarray(b4))
    out_ref = jnp.repeat(jnp.repeat(o, 2, axis=1), 2, axis=2)

    checks = [(tap, tap_ref, (B, Hh, Ww, 8)), (head, head_ref, (B, Hh, Ww, 4)),
              (z, z_ref, (B, Hh, Ww, 2)), (out, out_ref, (B, 2 * Hh, 2 * Ww, 3))]
    for got, ref, shp in checks:
        np.testing.assert_allclose(got.reshape(shp), np.asarray(ref),
                                   rtol=0.2, atol=0.2)


# ---------------------------------------------------------------------------
if __name__ == "__main__":
    _self_test()

    B, Cimg, H, W = 2, 1, 64, 64               # 64 = 2**(resolution_levels-1)
    num_classes = 2
    num_filters = [4, 8, 8, 8, 8, 8, 8]

    key = jax.random.PRNGKey(0)
    k_patch, k_mask, k_noise = jax.random.split(key, 3)
    patch = jax.random.normal(k_patch, (B, Cimg, H, W), jnp.float32)
    mask = jax.random.randint(k_mask, (B, H, W), 0, 2, jnp.int32)

    static, arrays = init_phiseg(seed=1, B=B, H=H, W=W, input_channels=Cimg,
                                 num_classes=num_classes, nf=num_filters)

    fwd = jax.jit(lambda arrs, p, m, r: phiseg_forward(
        static, arrs, p, m, r, training=True))
    s_out, aux = fwd(arrays, patch, mask, k_noise)

    for si in s_out:
        jax.block_until_ready(si)
        assert si.shape == (B, num_classes, H, W)
        assert bool(jnp.all(jnp.isfinite(si)))
    for m_ in aux["posterior_mu"] + aux["prior_mu"]:
        assert bool(jnp.all(jnp.isfinite(m_)))
    print("KERNEL_OK")
</pallas_src>

<mosaic_0001>
module attributes {stable_mosaic.version = 11 : i64} {
  func.func @kernel(%arg0: i32, %arg1: memref<1x8x24xbf16, #tpu.memory_space<vmem>>, %arg2: memref<1x4x20xbf16, #tpu.memory_space<vmem>>, %arg3: memref<1x8x16xf32, #tpu.memory_space<vmem>>, %arg4: memref<3x24x48xbf16, #tpu.memory_space<vmem>>, %arg5: memref<1x48xf32, #tpu.memory_space<vmem>>, %arg6: memref<4x8xbf16, #tpu.memory_space<vmem>>, %arg7: memref<48x24xbf16, #tpu.memory_space<vmem>>, %arg8: memref<3x24x28xbf16, #tpu.memory_space<vmem>>, %arg9: memref<1x28xf32, #tpu.memory_space<vmem>>, %arg10: memref<3x20x28xbf16, #tpu.memory_space<vmem>>, %arg11: memref<8x4xbf16, #tpu.memory_space<vmem>>, %arg12: memref<28x56xbf16, #tpu.memory_space<vmem>>, %arg13: memref<3x56x64xbf16, #tpu.memory_space<vmem>>, %arg14: memref<1x64xf32, #tpu.memory_space<vmem>>, %arg15: memref<3x48x64xbf16, #tpu.memory_space<vmem>>, %arg16: memref<1x64x32xbf16, #tpu.memory_space<vmem>>, %arg17: memref<1x32xf32, #tpu.memory_space<vmem>>, %arg18: memref<32x16xf32, #tpu.memory_space<vmem>>, %arg19: memref<32x16xf32, #tpu.memory_space<vmem>>, %arg20: memref<1x16x24xbf16, #tpu.memory_space<vmem>>, %arg21: memref<1x24xf32, #tpu.memory_space<vmem>>, %arg22: memref<16x8xbf16, #tpu.memory_space<vmem>>, %arg23: memref<24x48xbf16, #tpu.memory_space<vmem>>, %arg24: memref<1x8x64xbf16, #tpu.memory_space<vmem>>, %arg25: memref<1x8x32xf32, #tpu.memory_space<vmem>>, %arg26: memref<1x8x16xbf16, #tpu.memory_space<vmem>>, %arg27: memref<1x16x48xf32, #tpu.memory_space<vmem>>, %arg28: memref<10x56xf32, #tpu.memory_space<vmem>>) attributes {dimension_semantics = [#tpu.dimension_semantics<parallel>], iteration_bounds = array<i64: 2>, scalar_prefetch = 0 : i64, scratch_operands = 1 : i64, tpu.core_type = #tpu.core_type<tc>, window_params = [{transform_indices = @transform_0, window_bounds = array<i64: 1, 8, 24>}, {transform_indices = @transform_1, window_bounds = array<i64: 1, 4, 20>}, {transform_indices = @transform_2, window_bounds = array<i64: 1, 8, 16>}, {pipeline_mode = #tpu.pipeline_mode<synchronous>, transform_indices = @transform_3, window_bounds = array<i64: 3, 24, 48>}, {pipeline_mode = #tpu.pipeline_mode<synchronous>, transform_indices = @transform_4, window_bounds = array<i64: 1, 48>}, {pipeline_mode = #tpu.pipeline_mode<synchronous>, transform_indices = @transform_5, window_bounds = array<i64: 4, 8>}, {pipeline_mode = #tpu.pipeline_mode<synchronous>, transform_indices = @transform_6, window_bounds = array<i64: 48, 24>}, {pipeline_mode = #tpu.pipeline_mode<synchronous>, transform_indices = @transform_7, window_bounds = array<i64: 3, 24, 28>}, {pipeline_mode = #tpu.pipeline_mode<synchronous>, transform_indices = @transform_8, window_bounds = array<i64: 1, 28>}, {pipeline_mode = #tpu.pipeline_mode<synchronous>, transform_indices = @transform_9, window_bounds = array<i64: 3, 20, 28>}, {pipeline_mode = #tpu.pipeline_mode<synchronous>, transform_indices = @transform_10, window_bounds = array<i64: 8, 4>}, {pipeline_mode = #tpu.pipeline_mode<synchronous>, transform_indices = @transform_11, window_bounds = array<i64: 28, 56>}, {pipeline_mode = #tpu.pipeline_mode<synchronous>, transform_indices = @transform_12, window_bounds = array<i64: 3, 56, 64>}, {pipeline_mode = #tpu.pipeline_mode<synchronous>, transform_indices = @transform_13, window_bounds = array<i64: 1, 64>}, {pipeline_mode = #tpu.pipeline_mode<synchronous>, transform_indices = @transform_14, window_bounds = array<i64: 3, 48, 64>}, {pipeline_mode = #tpu.pipeline_mode<synchronous>, transform_indices = @transform_15, window_bounds = array<i64: 1, 64, 32>}, {pipeline_mode = #tpu.pipeline_mode<synchronous>, transform_indices = @transform_16, window_bounds = array<i64: 1, 32>}, {pipeline_mode = #tpu.pipeline_mode<synchronous>, transform_indices = @transform_17, window_bounds = array<i64: 32, 16>}, {pipeline_mode = #tpu.pipeline_mode<synchronous>, transform_indices = @transform_18, window_bounds = array<i64: 32, 16>}, {pipeline_mode = #tpu.pipeline_mode<synchronous>, transform_indices = @transform_19, window_bounds = array<i64: 1, 16, 24>}, {pipeline_mode = #tpu.pipeline_mode<synchronous>, transform_indices = @transform_20, window_bounds = array<i64: 1, 24>}, {pipeline_mode = #tpu.pipeline_mode<synchronous>, transform_indices = @transform_21, window_bounds = array<i64: 16, 8>}, {pipeline_mode = #tpu.pipeline_mode<synchronous>, transform_indices = @transform_22, window_bounds = array<i64: 24, 48>}, {transform_indices = @transform_23, window_bounds = array<i64: 1, 8, 64>}, {transform_indices = @transform_24, window_bounds = array<i64: 1, 8, 32>}, {transform_indices = @transform_25, window_bounds = array<i64: 1, 8, 16>}, {transform_indices = @transform_26, window_bounds = array<i64: 1, 16, 48>}]} {
    %c0 = arith.constant 0 : index
    %c0_0 = arith.constant 0 : index
    %c0_1 = arith.constant 0 : index
    %0 = vector.load %arg1[%c0, %c0_0, %c0_1] : memref<1x8x24xbf16, #tpu.memory_space<vmem>>, vector<1x8x24xbf16>
    %1 = vector.shape_cast %0 : vector<1x8x24xbf16> to vector<8x24xbf16>
    %2 = arith.extf %1 : vector<8x24xbf16> to vector<8x24xf32>
    %cst = arith.constant 0.000000e+00 : f32
    %3 = vector.broadcast %cst : f32 to vector<1x24xf32>
    %c0_2 = arith.constant 0 : index
    %c0_3 = arith.constant 0 : index
    %4 = vector.load %arg28[%c0_2, %c0_3] : memref<10x56xf32, #tpu.memory_space<vmem>>, vector<1x24xf32>
    tpu.vector_store %arg28[%c0_2, %c0_3], %3 {strides = array<i32>} : memref<10x56xf32, #tpu.memory_space<vmem>>, vector<1x24xf32>,
    %c9 = arith.constant 9 : index
    %c0_4 = arith.constant 0 : index
    %5 = vector.load %arg28[%c9, %c0_4] : memref<10x56xf32, #tpu.memory_space<vmem>>, vector<1x24xf32>
    tpu.vector_store %arg28[%c9, %c0_4], %3 {strides = array<i32>} : memref<10x56xf32, #tpu.memory_space<vmem>>, vector<1x24xf32>,
    %c1 = arith.constant 1 : index
    %c0_5 = arith.constant 0 : index
    %6 = vector.load %arg28[%c1, %c0_5] : memref<10x56xf32, #tpu.memory_space<vmem>>, vector<8x24xf32>
    tpu.vector_store %arg28[%c1, %c0_5], %2 {strides = array<i32>} : memref<10x56xf32, #tpu.memory_space<vmem>>, vector<8x24xf32>,
    %c0_6 = arith.constant 0 : index
    %c0_7 = arith.constant 0 : index
    %7 = vector.load %arg28[%c0_6, %c0_7] : memref<10x56xf32, #tpu.memory_space<vmem>>, vector<8x24xf32>
    %8 = arith.truncf %7 : vector<8x24xf32> to vector<8x24xbf16>
    %c0_8 = arith.constant 0 : index
    %c0_9 = arith.constant 0 : index
    %c0_10 = arith.constant 0 : index
    %9 = vector.load %arg4[%c0_8, %c0_9, %c0_10] : memref<3x24x48xbf16, #tpu.memory_space<vmem>>, vector<1x24x48xbf16>
    %10 = vector.shape_cast %9 : vector<1x24x48xbf16> to vector<24x48xbf16>
    %cst_11 = arith.constant dense<0.000000e+00> : vector<8x48xf32>
    %11 = tpu.matmul %8, %10, %cst_11 {dimension_numbers = #tpu.dot_dimension_numbers<[1], [0], [0], [1], [0, 0, 1, 1], [], []>} : vector<8x24xbf16>, vector<24x48xbf16>, vector<8x48xf32> -> vector<8x48xf32>
    %c1_12 = arith.constant 1 : index
    %c0_13 = arith.constant 0 : index
    %12 = vector.load %arg28[%c1_12, %c0_13] : memref<10x56xf32, #tpu.memory_space<vmem>>, vector<8x24xf32>
    %13 = arith.truncf %12 : vector<8x24xf32> to vector<8x24xbf16>
    %c1_14 = arith.constant 1 : index
    %c0_15 = arith.constant 0 : index
    %c0_16 = arith.constant 0 : index
    %14 = vector.load %arg4[%c1_14, %c0_15, %c0_16] : memref<3x24x48xbf16, #tpu.memory_space<vmem>>, vector<1x24x48xbf16>
    %15 = vector.shape_cast %14 : vector<1x24x48xbf16> to vector<24x48xbf16>
    %cst_17 = arith.constant dense<0.000000e+00> : vector<8x48xf32>
    %16 = tpu.matmul %13, %15, %cst_17 {dimension_numbers = #tpu.dot_dimension_numbers<[1], [0], [0], [1], [0, 0, 1, 1], [], []>} : vector<8x24xbf16>, vector<24x48xbf16>, vector<8x48xf32> -> vector<8x48xf32>
    %c2 = arith.constant 2 : index
    %c0_18 = arith.constant 0 : index
    %17 = vector.load %arg28[%c2, %c0_18] : memref<10x56xf32, #tpu.memory_space<vmem>>, vector<8x24xf32>
    %18 = arith.truncf %17 : vector<8x24xf32> to vector<8x24xbf16>
    %c2_19 = arith.constant 2 : index
    %c0_20 = arith.constant 0 : index
    %c0_21 = arith.constant 0 : index
    %19 = vector.load %arg4[%c2_19, %c0_20, %c0_21] : memref<3x24x48xbf16, #tpu.memory_space<vmem>>, vector<1x24x48xbf16>
    %20 = vector.shape_cast %19 : vector<1x24x48xbf16> to vector<24x48xbf16>
    %cst_22 = arith.constant dense<0.000000e+00> : vector<8x48xf32>
    %21 = tpu.matmul %18, %20, %cst_22 {dimension_numbers = #tpu.dot_dimension_numbers<[1], [0], [0], [1], [0, 0, 1, 1], [], []>} : vector<8x24xbf16>, vector<24x48xbf16>, vector<8x48xf32> -> vector<8x48xf32>
    %22 = arith.addf %11, %16 : vector<8x48xf32>
    %23 = arith.addf %22, %21 : vector<8x48xf32>
    %c0_23 = arith.constant 0 : index
    %c0_24 = arith.constant 0 : index
    %24 = vector.load %arg5[%c0_23, %c0_24] : memref<1x48xf32, #tpu.memory_space<vmem>>, vector<1x48xf32>
    %25 = vector.broadcast %24 : vector<1x48xf32> to vector<8x48xf32>
    %26 = arith.addf %23, %25 : vector<8x48xf32>
    %cst_25 = arith.constant 0.000000e+00 : f32
    %27 = vector.broadcast %cst_25 : f32 to vector<8x48xf32>
    %28 = arith.maximumf %26, %27 : vector<8x48xf32>
    %c0_26 = arith.constant 0 : index
    %c0_27 = arith.constant 0 : index
    %29 = vector.load %arg6[%c0_26, %c0_27] : memref<4x8xbf16, #tpu.memory_space<vmem>>, vector<4x8xbf16>
    %30 = arith.truncf %28 : vector<8x48xf32> to vector<8x48xbf16>
    %cst_28 = arith.constant dense<0.000000e+00> : vector<4x48xf32>
    %31 = tpu.matmul %29, %30, %cst_28 {dimension_numbers = #tpu.dot_dimension_numbers<[1], [0], [0], [1], [0, 0, 1, 1], [], []>} : vector<4x8xbf16>, vector<8x48xbf16>, vector<4x48xf32> -> vector<4x48xf32>
    %32 = arith.truncf %31 : vector<4x48xf32> to vector<4x48xbf16>
    %c0_29 = arith.constant 0 : index
    %c0_30 = arith.constant 0 : index
    %33 = vector.load %arg7[%c0_29, %c0_30] : memref<48x24xbf16, #tpu.memory_space<vmem>>, vector<48x24xbf16>
    %cst_31 = arith.constant dense<0.000000e+00> : vector<4x24xf32>
    %34 = tpu.matmul %32, %33, %cst_31 {dimension_numbers = #tpu.dot_dimension_numbers<[1], [0], [0], [1], [0, 0, 1, 1], [], []>} : vector<4x48xbf16>, vector<48x24xbf16>, vector<4x24xf32> -> vector<4x24xf32>
    %cst_32 = arith.constant 0.000000e+00 : f32
    %35 = vector.broadcast %cst_32 : f32 to vector<1x24xf32>
    %c0_33 = arith.constant 0 : index
    %c0_34 = arith.constant 0 : index
    %36 = vector.load %arg28[%c0_33, %c0_34] : memref<10x56xf32, #tpu.memory_space<vmem>>, vector<1x24xf32>
    tpu.vector_store %arg28[%c0_33, %c0_34], %35 {strides = array<i32>} : memref<10x56xf32, #tpu.memory_space<vmem>>, vector<1x24xf32>,
    %c5 = arith.constant 5 : index
    %c0_35 = arith.constant 0 : index
    %37 = vector.load %arg28[%c5, %c0_35] : memref<10x56xf32, #tpu.memory_space<vmem>>, vector<1x24xf32>
    tpu.vector_store %arg28[%c5, %c0_35], %35 {strides = array<i32>} : memref<10x56xf32, #tpu.memory_space<vmem>>, vector<1x24xf32>,
    %c1_36 = arith.constant 1 : index
    %c0_37 = arith.constant 0 : index
    %38 = vector.load %arg28[%c1_36, %c0_37] : memref<10x56xf32, #tpu.memory_space<vmem>>, vector<4x24xf32>
    tpu.vector_store %arg28[%c1_36, %c0_37], %34 {strides = array<i32>} : memref<10x56xf32, #tpu.memory_space<vmem>>, vector<4x24xf32>,
    %c0_38 = arith.constant 0 : index
    %c0_39 = arith.constant 0 : index
    %39 = vector.load %arg28[%c0_38, %c0_39] : memref<10x56xf32, #tpu.memory_space<vmem>>, vector<4x24xf32>
    %40 = arith.truncf %39 : vector<4x24xf32> to vector<4x24xbf16>
    %c0_40 = arith.constant 0 : index
    %c0_41 = arith.constant 0 : index
    %c0_42 = arith.constant 0 : index
    %41 = vector.load %arg8[%c0_40, %c0_41, %c0_42] : memref<3x24x28xbf16, #tpu.memory_space<vmem>>, vector<1x24x28xbf16>
    %42 = vector.shape_cast %41 : vector<1x24x28xbf16> to vector<24x28xbf16>
    %cst_43 = arith.constant dense<0.000000e+00> : vector<4x28xf32>
    %43 = tpu.matmul %40, %42, %cst_43 {dimension_numbers = #tpu.dot_dimension_numbers<[1], [0], [0], [1], [0, 0, 1, 1], [], []>} : vector<4x24xbf16>, vector<24x28xbf16>, vector<4x28xf32> -> vector<4x28xf32>
    %c1_44 = arith.constant 1 : index
    %c0_45 = arith.constant 0 : index
    %44 = vector.load %arg28[%c1_44, %c0_45] : memref<10x56xf32, #tpu.memory_space<vmem>>, vector<4x24xf32>
    %45 = arith.truncf %44 : vector<4x24xf32> to vector<4x24xbf16>
    %c1_46 = arith.constant 1 : index
    %c0_47 = arith.constant 0 : index
    %c0_48 = arith.constant 0 : index
    %46 = vector.load %arg8[%c1_46, %c0_47, %c0_48] : memref<3x24x28xbf16, #tpu.memory_space<vmem>>, vector<1x24x28xbf16>
    %47 = vector.shape_cast %46 : vector<1x24x28xbf16> to vector<24x28xbf16>
    %cst_49 = arith.constant dense<0.000000e+00> : vector<4x28xf32>
    %48 = tpu.matmul %45, %47, %cst_49 {dimension_numbers = #tpu.dot_dimension_numbers<[1], [0], [0], [1], [0, 0, 1, 1], [], []>} : vector<4x24xbf16>, vector<24x28xbf16>, vector<4x28xf32> -> vector<4x28xf32>
    %c2_50 = arith.constant 2 : index
    %c0_51 = arith.constant 0 : index
    %49 = vector.load %arg28[%c2_50, %c0_51] : memref<10x56xf32, #tpu.memory_space<vmem>>, vector<4x24xf32>
    %50 = arith.truncf %49 : vector<4x24xf32> to vector<4x24xbf16>
    %c2_52 = arith.constant 2 : index
    %c0_53 = arith.constant 0 : index
    %c0_54 = arith.constant 0 : index
    %51 = vector.load %arg8[%c2_52, %c0_53, %c0_54] : memref<3x24x28xbf16, #tpu.memory_space<vmem>>, vector<1x24x28xbf16>
    %52 = vector.shape_cast %51 : vector<1x24x28xbf16> to vector<24x28xbf16>
    %cst_55 = arith.constant dense<0.000000e+00> : vector<4x28xf32>
    %53 = tpu.matmul %50, %52, %cst_55 {dimension_numbers = #tpu.dot_dimension_numbers<[1], [0], [0], [1], [0, 0, 1, 1], [], []>} : vector<4x24xbf16>, vector<24x28xbf16>, vector<4x28xf32> -> vector<4x28xf32>
    %54 = arith.addf %43, %48 : vector<4x28xf32>
    %55 = arith.addf %54, %53 : vector<4x28xf32>
    %c0_56 = arith.constant 0 : index
    %c0_57 = arith.constant 0 : index
    %c0_58 = arith.constant 0 : index
    %56 = vector.load %arg2[%c0_56, %c0_57, %c0_58] : memref<1x4x20xbf16, #tpu.memory_space<vmem>>, vector<1x4x20xbf16>
    %57 = vector.shape_cast %56 : vector<1x4x20xbf16> to vector<4x20xbf16>
    %58 = arith.extf %57 : vector<4x20xbf16> to vector<4x20xf32>
    %cst_59 = arith.constant 0.000000e+00 : f32
    %59 = vector.broadcast %cst_59 : f32 to vector<1x20xf32>
    %c0_60 = arith.constant 0 : index
    %c0_61 = arith.constant 0 : index
    %60 = vector.load %arg28[%c0_60, %c0_61] : memref<10x56xf32, #tpu.memory_space<vmem>>, vector<1x20xf32>
    tpu.vector_store %arg28[%c0_60, %c0_61], %59 {strides = array<i32>} : memref<10x56xf32, #tpu.memory_space<vmem>>, vector<1x20xf32>,
    %c5_62 = arith.constant 5 : index
    %c0_63 = arith.constant 0 : index
    %61 = vector.load %arg28[%c5_62, %c0_63] : memref<10x56xf32, #tpu.memory_space<vmem>>, vector<1x20xf32>
    tpu.vector_store %arg28[%c5_62, %c0_63], %59 {strides = array<i32>} : memref<10x56xf32, #tpu.memory_space<vmem>>, vector<1x20xf32>,
    %c1_64 = arith.constant 1 : index
    %c0_65 = arith.constant 0 : index
    %62 = vector.load %arg28[%c1_64, %c0_65] : memref<10x56xf32, #tpu.memory_space<vmem>>, vector<4x20xf32>
    tpu.vector_store %arg28[%c1_64, %c0_65], %58 {strides = array<i32>} : memref<10x56xf32, #tpu.memory_space<vmem>>, vector<4x20xf32>,
    %c0_66 = arith.constant 0 : index
    %c0_67 = arith.constant 0 : index
    %63 = vector.load %arg28[%c0_66, %c0_67] : memref<10x56xf32, #tpu.memory_space<vmem>>, vector<4x20xf32>
    %64 = arith.truncf %63 : vector<4x20xf32> to vector<4x20xbf16>
    %c0_68 = arith.constant 0 : index
    %c0_69 = arith.constant 0 : index
    %c0_70 = arith.constant 0 : index
    %65 = vector.load %arg10[%c0_68, %c0_69, %c0_70] : memref<3x20x28xbf16, #tpu.memory_space<vmem>>, vector<1x20x28xbf16>
    %66 = vector.shape_cast %65 : vector<1x20x28xbf16> to vector<20x28xbf16>
    %cst_71 = arith.constant dense<0.000000e+00> : vector<4x28xf32>
    %67 = tpu.matmul %64, %66, %cst_71 {dimension_numbers = #tpu.dot_dimension_numbers<[1], [0], [0], [1], [0, 0, 1, 1], [], []>} : vector<4x20xbf16>, vector<20x28xbf16>, vector<4x28xf32> -> vector<4x28xf32>
    %c1_72 = arith.constant 1 : index
    %c0_73 = arith.constant 0 : index
    %68 = vector.load %arg28[%c1_72, %c0_73] : memref<10x56xf32, #tpu.memory_space<vmem>>, vector<4x20xf32>
    %69 = arith.truncf %68 : vector<4x20xf32> to vector<4x20xbf16>
    %c1_74 = arith.constant 1 : index
    %c0_75 = arith.constant 0 : index
    %c0_76 = arith.constant 0 : index
    %70 = vector.load %arg10[%c1_74, %c0_75, %c0_76] : memref<3x20x28xbf16, #tpu.memory_space<vmem>>, vector<1x20x28xbf16>
    %71 = vector.shape_cast %70 : vector<1x20x28xbf16> to vector<20x28xbf16>
    %cst_77 = arith.constant dense<0.000000e+00> : vector<4x28xf32>
    %72 = tpu.matmul %69, %71, %cst_77 {dimension_numbers = #tpu.dot_dimension_numbers<[1], [0], [0], [1], [0, 0, 1, 1], [], []>} : vector<4x20xbf16>, vector<20x28xbf16>, vector<4x28xf32> -> vector<4x28xf32>
    %c2_78 = arith.constant 2 : index
    %c0_79 = arith.constant 0 : index
    %73 = vector.load %arg28[%c2_78, %c0_79] : memref<10x56xf32, #tpu.memory_space<vmem>>, vector<4x20xf32>
    %74 = arith.truncf %73 : vector<4x20xf32> to vector<4x20xbf16>
    %c2_80 = arith.constant 2 : index
    %c0_81 = arith.constant 0 : index
    %c0_82 = arith.constant 0 : index
    %75 = vector.load %arg10[%c2_80, %c0_81, %c0_82] : memref<3x20x28xbf16, #tpu.memory_space<vmem>>, vector<1x20x28xbf16>
    %76 = vector.shape_cast %75 : vector<1x20x28xbf16> to vector<20x28xbf16>
    %cst_83 = arith.constant dense<0.000000e+00> : vector<4x28xf32>
    %77 = tpu.matmul %74, %76, %cst_83 {dimension_numbers = #tpu.dot_dimension_numbers<[1], [0], [0], [1], [0, 0, 1, 1], [], []>} : vector<4x20xbf16>, vector<20x28xbf16>, vector<4x28xf32> -> vector<4x28xf32>
    %78 = arith.addf %67, %72 : vector<4x28xf32>
    %79 = arith.addf %78, %77 : vector<4x28xf32>
    %80 = arith.addf %55, %79 : vector<4x28xf32>
    %c0_84 = arith.constant 0 : index
    %c0_85 = arith.constant 0 : index
    %81 = vector.load %arg9[%c0_84, %c0_85] : memref<1x28xf32, #tpu.memory_space<vmem>>, vector<1x28xf32>
    %82 = vector.broadcast %81 : vector<1x28xf32> to vector<4x28xf32>
    %83 = arith.addf %80, %82 : vector<4x28xf32>
    %cst_86 = arith.constant 0.000000e+00 : f32
    %84 = vector.broadcast %cst_86 : f32 to vector<4x28xf32>
    %85 = arith.maximumf %83, %84 : vector<4x28xf32>
    %c0_87 = arith.constant 0 : index
    %c0_88 = arith.constant 0 : index
    %86 = vector.load %arg11[%c0_87, %c0_88] : memref<8x4xbf16, #tpu.memory_space<vmem>>, vector<8x4xbf16>
    %87 = arith.truncf %85 : vector<4x28xf32> to vector<4x28xbf16>
    %cst_89 = arith.constant dense<0.000000e+00> : vector<8x28xf32>
    %88 = tpu.matmul %86, %87, %cst_89 {dimension_numbers = #tpu.dot_dimension_numbers<[1], [0], [0], [1], [0, 0, 1, 1], [], []>} : vector<8x4xbf16>, vector<4x28xbf16>, vector<8x28xf32> -> vector<8x28xf32>
    %89 = arith.truncf %88 : vector<8x28xf32> to vector<8x28xbf16>
    %c0_90 = arith.constant 0 : index
    %c0_91 = arith.constant 0 : index
    %90 = vector.load %arg12[%c0_90, %c0_91] : memref<28x56xbf16, #tpu.memory_space<vmem>>, vector<28x56xbf16>
    %cst_92 = arith.constant dense<0.000000e+00> : vector<8x56xf32>
    %91 = tpu.matmul %89, %90, %cst_92 {dimension_numbers = #tpu.dot_dimension_numbers<[1], [0], [0], [1], [0, 0, 1, 1], [], []>} : vector<8x28xbf16>, vector<28x56xbf16>, vector<8x56xf32> -> vector<8x56xf32>
    %cst_93 = arith.constant 0.000000e+00 : f32
    %92 = vector.broadcast %cst_93 : f32 to vector<1x56xf32>
    %c0_94 = arith.constant 0 : index
    %c0_95 = arith.constant 0 : index
    %93 = vector.load %arg28[%c0_94, %c0_95] : memref<10x56xf32, #tpu.memory_space<vmem>>, vector<1x56xf32>
    tpu.vector_store %arg28[%c0_94, %c0_95], %92 {strides = array<i32>} : memref<10x56xf32, #tpu.memory_space<vmem>>, vector<1x56xf32>,
    %c9_96 = arith.constant 9 : index
    %c0_97 = arith.constant 0 : index
    %94 = vector.load %arg28[%c9_96, %c0_97] : memref<10x56xf32, #tpu.memory_space<vmem>>, vector<1x56xf32>
    tpu.vector_store %arg28[%c9_96, %c0_97], %92 {strides = array<i32>} : memref<10x56xf32, #tpu.memory_space<vmem>>, vector<1x56xf32>,
    %c1_98 = arith.constant 1 : index
    %c0_99 = arith.constant 0 : index
    %95 = vector.load %arg28[%c1_98, %c0_99] : memref<10x56xf32, #tpu.memory_space<vmem>>, vector<8x56xf32>
    tpu.vector_store %arg28[%c1_98, %c0_99], %91 {strides = array<i32>} : memref<10x56xf32, #tpu.memory_space<vmem>>, vector<8x56xf32>,
    %c0_100 = arith.constant 0 : index
    %c0_101 = arith.constant 0 : index
    %96 = vector.load %arg28[%c0_100, %c0_101] : memref<10x56xf32, #tpu.memory_space<vmem>>, vector<8x56xf32>
    %97 = arith.truncf %96 : vector<8x56xf32> to vector<8x56xbf16>
    %c0_102 = arith.constant 0 : index
    %c0_103 = arith.constant 0 : index
    %c0_104 = arith.constant 0 : index
    %98 = vector.load %arg13[%c0_102, %c0_103, %c0_104] : memref<3x56x64xbf16, #tpu.memory_space<vmem>>, vector<1x56x64xbf16>
    %99 = vector.shape_cast %98 : vector<1x56x64xbf16> to vector<56x64xbf16>
    %cst_105 = arith.constant dense<0.000000e+00> : vector<8x64xf32>
    %100 = tpu.matmul %97, %99, %cst_105 {dimension_numbers = #tpu.dot_dimension_numbers<[1], [0], [0], [1], [0, 0, 1, 1], [], []>} : vector<8x56xbf16>, vector<56x64xbf16>, vector<8x64xf32> -> vector<8x64xf32>
    %c1_106 = arith.constant 1 : index
    %c0_107 = arith.constant 0 : index
    %101 = vector.load %arg28[%c1_106, %c0_107] : memref<10x56xf32, #tpu.memory_space<vmem>>, vector<8x56xf32>
    %102 = arith.truncf %101 : vector<8x56xf32> to vector<8x56xbf16>
    %c1_108 = arith.constant 1 : index
    %c0_109 = arith.constant 0 : index
    %c0_110 = arith.constant 0 : index
    %103 = vector.load %arg13[%c1_108, %c0_109, %c0_110] : memref<3x56x64xbf16, #tpu.memory_space<vmem>>, vector<1x56x64xbf16>
    %104 = vector.shape_cast %103 : vector<1x56x64xbf16> to vector<56x64xbf16>
    %cst_111 = arith.constant dense<0.000000e+00> : vector<8x64xf32>
    %105 = tpu.matmul %102, %104, %cst_111 {dimension_numbers = #tpu.dot_dimension_numbers<[1], [0], [0], [1], [0, 0, 1, 1], [], []>} : vector<8x56xbf16>, vector<56x64xbf16>, vector<8x64xf32> -> vector<8x64xf32>
    %c2_112 = arith.constant 2 : index
    %c0_113 = arith.constant 0 : index
    %106 = vector.load %arg28[%c2_112, %c0_113] : memref<10x56xf32, #tpu.memory_space<vmem>>, vector<8x56xf32>
    %107 = arith.truncf %106 : vector<8x56xf32> to vector<8x56xbf16>
    %c2_114 = arith.constant 2 : index
    %c0_115 = arith.constant 0 : index
    %c0_116 = arith.constant 0 : index
    %108 = vector.load %arg13[%c2_114, %c0_115, %c0_116] : memref<3x56x64xbf16, #tpu.memory_space<vmem>>, vector<1x56x64xbf16>
    %109 = vector.shape_cast %108 : vector<1x56x64xbf16> to vector<56x64xbf16>
    %cst_117 = arith.constant dense<0.000000e+00> : vector<8x64xf32>
    %110 = tpu.matmul %107, %109, %cst_117 {dimension_numbers = #tpu.dot_dimension_numbers<[1], [0], [0], [1], [0, 0, 1, 1], [], []>} : vector<8x56xbf16>, vector<56x64xbf16>, vector<8x64xf32> -> vector<8x64xf32>
    %111 = arith.addf %100, %105 : vector<8x64xf32>
    %112 = arith.addf %111, %110 : vector<8x64xf32>
    %cst_118 = arith.constant 0.000000e+00 : f32
    %113 = vector.broadcast %cst_118 : f32 to vector<1x48xf32>
    %c0_119 = arith.constant 0 : index
    %c0_120 = arith.constant 0 : index
    %114 = vector.load %arg28[%c0_119, %c0_120] : memref<10x56xf32, #tpu.memory_space<vmem>>, vector<1x48xf32>
    tpu.vector_store %arg28[%c0_119, %c0_120], %113 {strides = array<i32>} : memref<10x56xf32, #tpu.memory_space<vmem>>, vector<1x48xf32>,
    %c9_121 = arith.constant 9 : index
    %c0_122 = arith.constant 0 : index
    %115 = vector.load %arg28[%c9_121, %c0_122] : memref<10x56xf32, #tpu.memory_space<vmem>>, vector<1x48xf32>
    tpu.vector_store %arg28[%c9_121, %c0_122], %113 {strides = array<i32>} : memref<10x56xf32, #tpu.memory_space<vmem>>, vector<1x48xf32>,
    %c1_123 = arith.constant 1 : index
    %c0_124 = arith.constant 0 : index
    %116 = vector.load %arg28[%c1_123, %c0_124] : memref<10x56xf32, #tpu.memory_space<vmem>>, vector<8x48xf32>
    tpu.vector_store %arg28[%c1_123, %c0_124], %28 {strides = array<i32>} : memref<10x56xf32, #tpu.memory_space<vmem>>, vector<8x48xf32>,
    %c0_125 = arith.constant 0 : index
    %c0_126 = arith.constant 0 : index
    %117 = vector.load %arg28[%c0_125, %c0_126] : memref<10x56xf32, #tpu.memory_space<vmem>>, vector<8x48xf32>
    %118 = arith.truncf %117 : vector<8x48xf32> to vector<8x48xbf16>
    %c0_127 = arith.constant 0 : index
    %c0_128 = arith.constant 0 : index
    %c0_129 = arith.constant 0 : index
    %119 = vector.load %arg15[%c0_127, %c0_128, %c0_129] : memref<3x48x64xbf16, #tpu.memory_space<vmem>>, vector<1x48x64xbf16>
    %120 = vector.shape_cast %119 : vector<1x48x64xbf16> to vector<48x64xbf16>
    %cst_130 = arith.constant dense<0.000000e+00> : vector<8x64xf32>
    %121 = tpu.matmul %118, %120, %cst_130 {dimension_numbers = #tpu.dot_dimension_numbers<[1], [0], [0], [1], [0, 0, 1, 1], [], []>} : vector<8x48xbf16>, vector<48x64xbf16>, vector<8x64xf32> -> vector<8x64xf32>
    %c1_131 = arith.constant 1 : index
    %c0_132 = arith.constant 0 : index
    %122 = vector.load %arg28[%c1_131, %c0_132] : memref<10x56xf32, #tpu.memory_space<vmem>>, vector<8x48xf32>
    %123 = arith.truncf %122 : vector<8x48xf32> to vector<8x48xbf16>
    %c1_133 = arith.constant 1 : index
    %c0_134 = arith.constant 0 : index
    %c0_135 = arith.constant 0 : index
    %124 = vector.load %arg15[%c1_133, %c0_134, %c0_135] : memref<3x48x64xbf16, #tpu.memory_space<vmem>>, vector<1x48x64xbf16>
    %125 = vector.shape_cast %124 : vector<1x48x64xbf16> to vector<48x64xbf16>
    %cst_136 = arith.constant dense<0.000000e+00> : vector<8x64xf32>
    %126 = tpu.matmul %123, %125, %cst_136 {dimension_numbers = #tpu.dot_dimension_numbers<[1], [0], [0], [1], [0, 0, 1, 1], [], []>} : vector<8x48xbf16>, vector<48x64xbf16>, vector<8x64xf32> -> vector<8x64xf32>
    %c2_137 = arith.constant 2 : index
    %c0_138 = arith.constant 0 : index
    %127 = vector.load %arg28[%c2_137, %c0_138] : memref<10x56xf32, #tpu.memory_space<vmem>>, vector<8x48xf32>
    %128 = arith.truncf %127 : vector<8x48xf32> to vector<8x48xbf16>
    %c2_139 = arith.constant 2 : index
    %c0_140 = arith.constant 0 : index
    %c0_141 = arith.constant 0 : index
    %129 = vector.load %arg15[%c2_139, %c0_140, %c0_141] : memref<3x48x64xbf16, #tpu.memory_space<vmem>>, vector<1x48x64xbf16>
    %130 = vector.shape_cast %129 : vector<1x48x64xbf16> to vector<48x64xbf16>
    %cst_142 = arith.constant dense<0.000000e+00> : vector<8x64xf32>
    %131 = tpu.matmul %128, %130, %cst_142 {dimension_numbers = #tpu.dot_dimension_numbers<[1], [0], [0], [1], [0, 0, 1, 1], [], []>} : vector<8x48xbf16>, vector<48x64xbf16>, vector<8x64xf32> -> vector<8x64xf32>
    %132 = arith.addf %121, %126 : vector<8x64xf32>
    %133 = arith.addf %132, %131 : vector<8x64xf32>
    %134 = arith.addf %112, %133 : vector<8x64xf32>
    %c0_143 = arith.constant 0 : index
    %c0_144 = arith.constant 0 : index
    %135 = vector.load %arg14[%c0_143, %c0_144] : memref<1x64xf32, #tpu.memory_space<vmem>>, vector<1x64xf32>
    %136 = vector.broadcast %135 : vector<1x64xf32> to vector<8x64xf32>
    %137 = arith.addf %134, %136 : vector<8x64xf32>
    %cst_145 = arith.constant 0.000000e+00 : f32
    %138 = vector.broadcast %cst_145 : f32 to vector<8x64xf32>
    %139 = arith.maximumf %137, %138 : vector<8x64xf32>
    %140 = arith.truncf %139 : vector<8x64xf32> to vector<8x64xbf16>
    %c0_146 = arith.constant 0 : index
    %c0_147 = arith.constant 0 : index
    %c0_148 = arith.constant 0 : index
    %141 = vector.load %arg24[%c0_146, %c0_147, %c0_148] : memref<1x8x64xbf16, #tpu.memory_space<vmem>>, vector<1x8x64xbf16>
    %142 = vector.shape_cast %141 : vector<1x8x64xbf16> to vector<8x64xbf16>
    %143 = vector.shape_cast %140 : vector<8x64xbf16> to vector<1x8x64xbf16>
    tpu.vector_store %arg24[%c0_146, %c0_147, %c0_148], %143 {strides = array<i32>} : memref<1x8x64xbf16, #tpu.memory_space<vmem>>, vector<1x8x64xbf16>,
    %144 = arith.truncf %139 : vector<8x64xf32> to vector<8x64xbf16>
    %c0_149 = arith.constant 0 : index
    %c0_150 = arith.constant 0 : index
    %c0_151 = arith.constant 0 : index
    %145 = vector.load %arg16[%c0_149, %c0_150, %c0_151] : memref<1x64x32xbf16, #tpu.memory_space<vmem>>, vector<1x64x32xbf16>
    %146 = vector.shape_cast %145 : vector<1x64x32xbf16> to vector<64x32xbf16>
    %cst_152 = arith.constant dense<0.000000e+00> : vector<8x32xf32>
    %147 = tpu.matmul %144, %146, %cst_152 {dimension_numbers = #tpu.dot_dimension_numbers<[1], [0], [0], [1], [0, 0, 1, 1], [], []>} : vector<8x64xbf16>, vector<64x32xbf16>, vector<8x32xf32> -> vector<8x32xf32>
    %c0_153 = arith.constant 0 : index
    %c0_154 = arith.constant 0 : index
    %148 = vector.load %arg17[%c0_153, %c0_154] : memref<1x32xf32, #tpu.memory_space<vmem>>, vector<1x32xf32>
    %149 = vector.broadcast %148 : vector<1x32xf32> to vector<8x32xf32>
    %150 = arith.addf %147, %149 : vector<8x32xf32>
    %151 = tpu.iota {dimensions = array<i32: 1>} : vector<8x32xi32>
    %152 = math.absf %150 : vector<8x32xf32>
    %cst_155 = arith.constant 0.000000e+00 : f32
    %153 = vector.broadcast %cst_155 : f32 to vector<8x32xf32>
    %154 = arith.subf %153, %152 : vector<8x32xf32>
    %155 = math.exp %154 : vector<8x32xf32>
    %cst_156 = arith.constant 1.000000e+00 : f32
    %156 = vector.broadcast %cst_156 : f32 to vector<8x32xf32>
    %157 = arith.addf %156, %155 : vector<8x32xf32>
    %158 = math.log %157 : vector<8x32xf32>
    %cst_157 = arith.constant 0.000000e+00 : f32
    %159 = vector.broadcast %cst_157 : f32 to vector<8x32xf32>
    %160 = arith.maximumf %150, %159 : vector<8x32xf32>
    %161 = arith.addf %158, %160 : vector<8x32xf32>
    %c3_i32 = arith.constant 3 : i32
    %162 = vector.broadcast %c3_i32 : i32 to vector<8x32xi32>
    %163 = arith.andi %151, %162 : vector<8x32xi32>
    %c2_i32 = arith.constant 2 : i32
    %164 = vector.broadcast %c2_i32 : i32 to vector<8x32xi32>
    %165 = arith.cmpi sge, %163, %164 : vector<8x32xi32>
    %166 = arith.select %165, %161, %150 : vector<8x32xi1>, vector<8x32xf32>
    %c0_158 = arith.constant 0 : index
    %c0_159 = arith.constant 0 : index
    %c0_160 = arith.constant 0 : index
    %167 = vector.load %arg25[%c0_158, %c0_159, %c0_160] : memref<1x8x32xf32, #tpu.memory_space<vmem>>, vector<1x8x32xf32>
    %168 = vector.shape_cast %167 : vector<1x8x32xf32> to vector<8x32xf32>
    %169 = vector.shape_cast %166 : vector<8x32xf32> to vector<1x8x32xf32>
    tpu.vector_store %arg25[%c0_158, %c0_159, %c0_160], %169 {strides = array<i32>} : memref<1x8x32xf32, #tpu.memory_space<vmem>>, vector<1x8x32xf32>,
    %c0_161 = arith.constant 0 : index
    %c0_162 = arith.constant 0 : index
    %c0_163 = arith.constant 0 : index
    %170 = vector.load %arg3[%c0_161, %c0_162, %c0_163] : memref<1x8x16xf32, #tpu.memory_space<vmem>>, vector<1x8x16xf32>
    %171 = vector.shape_cast %170 : vector<1x8x16xf32> to vector<8x16xf32>
    %c0_164 = arith.constant 0 : index
    %c0_165 = arith.constant 0 : index
    %172 = vector.load %arg18[%c0_164, %c0_165] : memref<32x16xf32, #tpu.memory_space<vmem>>, vector<32x16xf32>
    %cst_166 = arith.constant dense<0.000000e+00> : vector<8x16xf32>
    %173 = tpu.matmul %166, %172, %cst_166 {dimension_numbers = #tpu.dot_dimension_numbers<[1], [0], [0], [1], [0, 0, 1, 1], [], []>} : vector<8x32xf32>, vector<32x16xf32>, vector<8x16xf32> -> vector<8x16xf32>
    %c0_167 = arith.constant 0 : index
    %c0_168 = arith.constant 0 : index
    %174 = vector.load %arg19[%c0_167, %c0_168] : memref<32x16xf32, #tpu.memory_space<vmem>>, vector<32x16xf32>
    %cst_169 = arith.constant dense<0.000000e+00> : vector<8x16xf32>
    %175 = tpu.matmul %166, %174, %cst_169 {dimension_numbers = #tpu.dot_dimension_numbers<[1], [0], [0], [1], [0, 0, 1, 1], [], []>} : vector<8x32xf32>, vector<32x16xf32>, vector<8x16xf32> -> vector<8x16xf32>
    %176 = arith.mulf %175, %171 : vector<8x16xf32>
    %177 = arith.addf %173, %176 : vector<8x16xf32>
    %178 = arith.truncf %177 : vector<8x16xf32> to vector<8x16xbf16>
    %c0_170 = arith.constant 0 : index
    %c0_171 = arith.constant 0 : index
    %c0_172 = arith.constant 0 : index
    %179 = vector.load %arg26[%c0_170, %c0_171, %c0_172] : memref<1x8x16xbf16, #tpu.memory_space<vmem>>, vector<1x8x16xbf16>
    %180 = vector.shape_cast %179 : vector<1x8x16xbf16> to vector<8x16xbf16>
    %181 = vector.shape_cast %178 : vector<8x16xbf16> to vector<1x8x16xbf16>
    tpu.vector_store %arg26[%c0_170, %c0_171, %c0_172], %181 {strides = array<i32>} : memref<1x8x16xbf16, #tpu.memory_space<vmem>>, vector<1x8x16xbf16>,
    %182 = arith.truncf %177 : vector<8x16xf32> to vector<8x16xbf16>
    %c0_173 = arith.constant 0 : index
    %c0_174 = arith.constant 0 : index
    %c0_175 = arith.constant 0 : index
    %183 = vector.load %arg20[%c0_173, %c0_174, %c0_175] : memref<1x16x24xbf16, #tpu.memory_space<vmem>>, vector<1x16x24xbf16>
    %184 = vector.shape_cast %183 : vector<1x16x24xbf16> to vector<16x24xbf16>
    %cst_176 = arith.constant dense<0.000000e+00> : vector<8x24xf32>
    %185 = tpu.matmul %182, %184, %cst_176 {dimension_numbers = #tpu.dot_dimension_numbers<[1], [0], [0], [1], [0, 0, 1, 1], [], []>} : vector<8x16xbf16>, vector<16x24xbf16>, vector<8x24xf32> -> vector<8x24xf32>
    %c0_177 = arith.constant 0 : index
    %c0_178 = arith.constant 0 : index
    %186 = vector.load %arg21[%c0_177, %c0_178] : memref<1x24xf32, #tpu.memory_space<vmem>>, vector<1x24xf32>
    %187 = vector.broadcast %186 : vector<1x24xf32> to vector<8x24xf32>
    %188 = arith.addf %185, %187 : vector<8x24xf32>
    %c0_179 = arith.constant 0 : index
    %c0_180 = arith.constant 0 : index
    %189 = vector.load %arg22[%c0_179, %c0_180] : memref<16x8xbf16, #tpu.memory_space<vmem>>, vector<16x8xbf16>
    %190 = arith.truncf %188 : vector<8x24xf32> to vector<8x24xbf16>
    %cst_181 = arith.constant dense<0.000000e+00> : vector<16x24xf32>
    %191 = tpu.matmul %189, %190, %cst_181 {dimension_numbers = #tpu.dot_dimension_numbers<[1], [0], [0], [1], [0, 0, 1, 1], [], []>} : vector<16x8xbf16>, vector<8x24xbf16>, vector<16x24xf32> -> vector<16x24xf32>
    %192 = arith.truncf %191 : vector<16x24xf32> to vector<16x24xbf16>
    %c0_182 = arith.constant 0 : index
    %c0_183 = arith.constant 0 : index
    %193 = vector.load %arg23[%c0_182, %c0_183] : memref<24x48xbf16, #tpu.memory_space<vmem>>, vector<24x48xbf16>
    %cst_184 = arith.constant dense<0.000000e+00> : vector<16x48xf32>
    %194 = tpu.matmul %192, %193, %cst_184 {dimension_numbers = #tpu.dot_dimension_numbers<[1], [0], [0], [1], [0, 0, 1, 1], [], []>} : vector<16x24xbf16>, vector<24x48xbf16>, vector<16x48xf32> -> vector<16x48xf32>
    %c0_185 = arith.constant 0 : index
    %c0_186 = arith.constant 0 : index
    %c0_187 = arith.constant 0 : index
    %195 = vector.load %arg27[%c0_185, %c0_186, %c0_187] : memref<1x16x48xf32, #tpu.memory_space<vmem>>, vector<1x16x48xf32>
    %196 = vector.shape_cast %195 : vector<1x16x48xf32> to vector<16x48xf32>
    %197 = vector.shape_cast %194 : vector<16x48xf32> to vector<1x16x48xf32>
    tpu.vector_store %arg27[%c0_185, %c0_186, %c0_187], %197 {strides = array<i32>} : memref<1x16x48xf32, #tpu.memory_space<vmem>>, vector<1x16x48xf32>,
    return
  }
  func.func @transform_0(%arg0: i32) -> (i32, i32, i32) {
    %c0_i32 = arith.constant 0 : i32
    %c0_i32_0 = arith.constant 0 : i32
    %c0_i32_1 = arith.constant 0 : i32
    return %arg0, %c0_i32, %c0_i32_0 : i32, i32, i32
  }
  func.func @transform_1(%arg0: i32) -> (i32, i32, i32) {
    %c0_i32 = arith.constant 0 : i32
    %c0_i32_0 = arith.constant 0 : i32
    %c0_i32_1 = arith.constant 0 : i32
    return %arg0, %c0_i32, %c0_i32_0 : i32, i32, i32
  }
  func.func @transform_2(%arg0: i32) -> (i32, i32, i32) {
    %c0_i32 = arith.constant 0 : i32
    %c0_i32_0 = arith.constant 0 : i32
    %c0_i32_1 = arith.constant 0 : i32
    return %arg0, %c0_i32, %c0_i32_0 : i32, i32, i32
  }
  func.func @transform_3(%arg0: i32) -> (i32, i32, i32) {
    %c0_i32 = arith.constant 0 : i32
    %c0_i32_0 = arith.constant 0 : i32
    %c0_i32_1 = arith.constant 0 : i32
    %c0_i32_2 = arith.constant 0 : i32
    return %c0_i32, %c0_i32_0, %c0_i32_1 : i32, i32, i32
  }
  func.func @transform_4(%arg0: i32) -> (i32, i32) {
    %c0_i32 = arith.constant 0 : i32
    %c0_i32_0 = arith.constant 0 : i32
    %c0_i32_1 = arith.constant 0 : i32
    return %c0_i32, %c0_i32_0 : i32, i32
  }
  func.func @transform_5(%arg0: i32) -> (i32, i32) {
    %c0_i32 = arith.constant 0 : i32
    %c0_i32_0 = arith.constant 0 : i32
    %c0_i32_1 = arith.constant 0 : i32
    return %c0_i32, %c0_i32_0 : i32, i32
  }
  func.func @transform_6(%arg0: i32) -> (i32, i32) {
    %c0_i32 = arith.constant 0 : i32
    %c0_i32_0 = arith.constant 0 : i32
    %c0_i32_1 = arith.constant 0 : i32
    return %c0_i32, %c0_i32_0 : i32, i32
  }
  func.func @transform_7(%arg0: i32) -> (i32, i32, i32) {
    %c0_i32 = arith.constant 0 : i32
    %c0_i32_0 = arith.constant 0 : i32
    %c0_i32_1 = arith.constant 0 : i32
    %c0_i32_2 = arith.constant 0 : i32
    return %c0_i32, %c0_i32_0, %c0_i32_1 : i32, i32, i32
  }
  func.func @transform_8(%arg0: i32) -> (i32, i32) {
    %c0_i32 = arith.constant 0 : i32
    %c0_i32_0 = arith.constant 0 : i32
    %c0_i32_1 = arith.constant 0 : i32
    return %c0_i32, %c0_i32_0 : i32, i32
  }
  func.func @transform_9(%arg0: i32) -> (i32, i32, i32) {
    %c0_i32 = arith.constant 0 : i32
    %c0_i32_0 = arith.constant 0 : i32
    %c0_i32_1 = arith.constant 0 : i32
    %c0_i32_2 = arith.constant 0 : i32
    return %c0_i32, %c0_i32_0, %c0_i32_1 : i32, i32, i32
  }
  func.func @transform_10(%arg0: i32) -> (i32, i32) {
    %c0_i32 = arith.constant 0 : i32
    %c0_i32_0 = arith.constant 0 : i32
    %c0_i32_1 = arith.constant 0 : i32
    return %c0_i32, %c0_i32_0 : i32, i32
  }
  func.func @transform_11(%arg0: i32) -> (i32, i32) {
    %c0_i32 = arith.constant 0 : i32
    %c0_i32_0 = arith.constant 0 : i32
    %c0_i32_1 = arith.constant 0 : i32
    return %c0_i32, %c0_i32_0 : i32, i32
  }
  func.func @transform_12(%arg0: i32) -> (i32, i32, i32) {
    %c0_i32 = arith.constant 0 : i32
    %c0_i32_0 = arith.constant 0 : i32
    %c0_i32_1 = arith.constant 0 : i32
    %c0_i32_2 = arith.constant 0 : i32
    return %c0_i32, %c0_i32_0, %c0_i32_1 : i32, i32, i32
  }
  func.func @transform_13(%arg0: i32) -> (i32, i32) {
    %c0_i32 = arith.constant 0 : i32
    %c0_i32_0 = arith.constant 0 : i32
    %c0_i32_1 = arith.constant 0 : i32
    return %c0_i32, %c0_i32_0 : i32, i32
  }
  func.func @transform_14(%arg0: i32) -> (i32, i32, i32) {
    %c0_i32 = arith.constant 0 : i32
    %c0_i32_0 = arith.constant 0 : i32
    %c0_i32_1 = arith.constant 0 : i32
    %c0_i32_2 = arith.constant 0 : i32
    return %c0_i32, %c0_i32_0, %c0_i32_1 : i32, i32, i32
  }
  func.func @transform_15(%arg0: i32) -> (i32, i32, i32) {
    %c0_i32 = arith.constant 0 : i32
    %c0_i32_0 = arith.constant 0 : i32
    %c0_i32_1 = arith.constant 0 : i32
    %c0_i32_2 = arith.constant 0 : i32
    return %c0_i32, %c0_i32_0, %c0_i32_1 : i32, i32, i32
  }
  func.func @transform_16(%arg0: i32) -> (i32, i32) {
    %c0_i32 = arith.constant 0 : i32
    %c0_i32_0 = arith.constant 0 : i32
    %c0_i32_1 = arith.constant 0 : i32
    return %c0_i32, %c0_i32_0 : i32, i32
  }
  func.func @transform_17(%arg0: i32) -> (i32, i32) {
    %c0_i32 = arith.constant 0 : i32
    %c0_i32_0 = arith.constant 0 : i32
    %c0_i32_1 = arith.constant 0 : i32
    return %c0_i32, %c0_i32_0 : i32, i32
  }
  func.func @transform_18(%arg0: i32) -> (i32, i32) {
    %c0_i32 = arith.constant 0 : i32
    %c0_i32_0 = arith.constant 0 : i32
    %c0_i32_1 = arith.constant 0 : i32
    return %c0_i32, %c0_i32_0 : i32, i32
  }
  func.func @transform_19(%arg0: i32) -> (i32, i32, i32) {
    %c0_i32 = arith.constant 0 : i32
    %c0_i32_0 = arith.constant 0 : i32
    %c0_i32_1 = arith.constant 0 : i32
    %c0_i32_2 = arith.constant 0 : i32
    return %c0_i32, %c0_i32_0, %c0_i32_1 : i32, i32, i32
  }
  func.func @transform_20(%arg0: i32) -> (i32, i32) {
    %c0_i32 = arith.constant 0 : i32
    %c0_i32_0 = arith.constant 0 : i32
    %c0_i32_1 = arith.constant 0 : i32
    return %c0_i32, %c0_i32_0 : i32, i32
  }
  func.func @transform_21(%arg0: i32) -> (i32, i32) {
    %c0_i32 = arith.constant 0 : i32
    %c0_i32_0 = arith.constant 0 : i32
    %c0_i32_1 = arith.constant 0 : i32
    return %c0_i32, %c0_i32_0 : i32, i32
  }
  func.func @transform_22(%arg0: i32) -> (i32, i32) {
    %c0_i32 = arith.constant 0 : i32
    %c0_i32_0 = arith.constant 0 : i32
    %c0_i32_1 = arith.constant 0 : i32
    return %c0_i32, %c0_i32_0 : i32, i32
  }
  func.func @transform_23(%arg0: i32) -> (i32, i32, i32) {
    %c0_i32 = arith.constant 0 : i32
    %c0_i32_0 = arith.constant 0 : i32
    %c0_i32_1 = arith.constant 0 : i32
    return %arg0, %c0_i32, %c0_i32_0 : i32, i32, i32
  }
  func.func @transform_24(%arg0: i32) -> (i32, i32, i32) {
    %c0_i32 = arith.constant 0 : i32
    %c0_i32_0 = arith.constant 0 : i32
    %c0_i32_1 = arith.constant 0 : i32
    return %arg0, %c0_i32, %c0_i32_0 : i32, i32, i32
  }
  func.func @transform_25(%arg0: i32) -> (i32, i32, i32) {
    %c0_i32 = arith.constant 0 : i32
    %c0_i32_0 = arith.constant 0 : i32
    %c0_i32_1 = arith.constant 0 : i32
    return %arg0, %c0_i32, %c0_i32_0 : i32, i32, i32
  }
  func.func @transform_26(%arg0: i32) -> (i32, i32, i32) {
    %c0_i32 = arith.constant 0 : i32
    %c0_i32_0 = arith.constant 0 : i32
    %c0_i32_1 = arith.constant 0 : i32
    return %arg0, %c0_i32, %c0_i32_0 : i32, i32, i32
  }
}

</mosaic_0001>

<bundles_post_ra>
// kernel: tpu_custom_call.1
= control target key start
LH: loop header
LB: loop body
LE: loop exit
PB: predicated region body
PF: predicated region fallthrough
CT: control target
= control target key end

     0   :  { %s3916_s0 = inlined_call_operand.hbm [shape: bf16[2,8,24], index: 0, kind: input, shape index: {}]   ;;  %s3917_s1 = inlined_call_operand.hbm [shape: bf16[2,4,20], index: 1, kind: input, shape index: {}]   ;;  %s3918_s2 = inlined_call_operand.vmem [shape: f32[2,8,16], index: 2, kind: input, shape index: {}]   ;;  %s3919_s3 = inlined_call_operand.vmem [shape: bf16[3,24,48], index: 3, kind: input, shape index: {}]   ;;  %s3920_s4 = inlined_call_operand.hbm [shape: f32[1,48], index: 4, kind: input, shape index: {}]   ;;  %s3921_s5 = inlined_call_operand.vmem [shape: bf16[4,8], index: 5, kind: input, shape index: {}]   ;;  %s3922_s6 = inlined_call_operand.vmem [shape: bf16[48,24], index: 6, kind: input, shape index: {}]   ;;  %s3923_s7 = inlined_call_operand.hbm [shape: bf16[3,24,28], index: 7, kind: input, shape index: {}]   ;;  %s3924_s8 = inlined_call_operand.hbm [shape: f32[1,28], index: 8, kind: input, shape index: {}]   ;;  %s3925_s9 = inlined_call_operand.hbm [shape: bf16[3,20,28], index: 9, kind: input, shape index: {}]   ;;  %s3926_s10 = inlined_call_operand.vmem [shape: bf16[8,4], index: 10, kind: input, shape index: {}]   ;;  %s3927_s11 = inlined_call_operand.hbm [shape: bf16[28,56], index: 11, kind: input, shape index: {}]   ;;  %s3928_s12 = inlined_call_operand.hbm [shape: bf16[3,56,64], index: 12, kind: input, shape index: {}]   ;;  %s3929_s13 = inlined_call_operand.hbm [shape: f32[1,64], index: 13, kind: input, shape index: {}]   ;;  %s3930_s14 = inlined_call_operand.vmem [shape: bf16[3,48,64], index: 14, kind: input, shape index: {}]   ;;  %s3931_s15 = inlined_call_operand.vmem [shape: bf16[1,64,32], index: 15, kind: input, shape index: {}]   ;;  %s3932_s16 = inlined_call_operand.hbm [shape: f32[1,32], index: 16, kind: input, shape index: {}]   ;;  %s3933_s17 = inlined_call_operand.vmem [shape: f32[32,16], index: 17, kind: input, shape index: {}]   ;;  %s3934_s18 = inlined_call_operand.vmem [shape: f32[32,16], index: 18, kind: input, shape index: {}]   ;;  %s3935_s19 = inlined_call_operand.vmem [shape: bf16[1,16,24], index: 19, kind: input, shape index: {}]   ;;  %s3936_s20 = inlined_call_operand.vmem [shape: f32[1,24], index: 20, kind: input, shape index: {}]   ;;  %s3937_s21 = inlined_call_operand.vmem [shape: bf16[16,8], index: 21, kind: input, shape index: {}]   ;;  %s3938_s22 = inlined_call_operand.vmem [shape: bf16[24,48], index: 22, kind: input, shape index: {}]   ;;  %s3939_s23 = inlined_call_operand.hbm [shape: bf16[2,8,64], index: 23, kind: output, shape index: {0}]   ;;  %s3940_s24 = inlined_call_operand.hbm [shape: f32[2,8,32], index: 24, kind: output, shape index: {1}]   ;;  %s3941_s25 = inlined_call_operand.hbm [shape: bf16[2,8,16], index: 25, kind: output, shape index: {2}]   ;;  %s3942_s26 = inlined_call_operand.hbm [shape: f32[2,16,48], index: 26, kind: output, shape index: {3}]  }
   0x1   :  { %3966 = sst [smem:[#allocation42_spill]] %s3916_s0 }
   0x2   :  { %3967 = sst [smem:[#allocation43_spill]] %s3917_s1 }
   0x3   :  { %3968 = sst [smem:[#allocation44_spill]] %s3918_s2 }
   0x4   :  { %3969 = sst [smem:[#allocation45_spill]] %s3919_s3 }
   0x5   :  { %3970 = sst [smem:[#allocation46_spill]] %s3920_s4 }
   0x6   :  { %3971 = sst [smem:[#allocation47_spill]] %s3921_s5 }
   0x7   :  { %3972 = sst [smem:[#allocation48_spill]] %s3922_s6 }
   0x8   :  { %3973 = sst [smem:[#allocation49_spill]] %s3923_s7 }
   0x9   :  { %3974 = sst [smem:[#allocation50_spill]] %s3924_s8 }
   0xa   :  { %3975 = sst [smem:[#allocation51_spill]] %s3925_s9 }
   0xb   :  { %3976 = sst [smem:[#allocation52_spill]] %s3926_s10 }
   0xc   :  { %3977 = sst [smem:[#allocation53_spill]] %s3927_s11 }
   0xd   :  { %3978 = sst [smem:[#allocation54_spill]] %s3928_s12 }
   0xe   :  { %3979 = sst [smem:[#allocation55_spill]] %s3929_s13 }
   0xf   :  { %3980 = sst [smem:[#allocation56_spill]] %s3930_s14 }
  0x10   :  { %3981 = sst [smem:[#allocation57_spill]] %s3932_s16 }
  0x11   :  { %3982 = sst [smem:[#allocation58_spill]] %s3937_s21 }
  0x12   :  { %3983 = sst [smem:[#allocation59_spill]] %s3938_s22 }
  0x13   :  { %3984 = sst [smem:[#allocation60_spill]] %s3939_s23 }
  0x14   :  { %3985 = sst [smem:[#allocation61_spill]] %s3940_s24 }
  0x15   :  { %3986 = sst [smem:[#allocation62_spill]] %s3941_s25 }
  0x16   :  { %3987 = sst [smem:[#allocation63_spill]] %s3942_s26 }
  0x17   :  { %32 = vsyncpa [#allocation4], 0 }
  0x18   :  { %34 = vsyncpa [#allocation4 + $0x1], 0 }
  0x19   :  { %35 = vsyncpa [#allocation7], 0 }
  0x1a   :  { %37 = vsyncpa [#allocation7 + $0x1], 0 }
  0x1b   :  { %38 = vsyncpa [#allocation10], 0 }
  0x1c   :  { %39 = vsyncpa [#allocation13], 0 }
  0x1d   :  { %40 = vsyncpa [#allocation16], 0 }
  0x1e   :  { %41 = vsyncpa [#allocation19], 0 }
  0x1f   :  { %42 = vsyncpa [#allocation5], 0 }
  0x20   :  { %44 = vsyncpa [#allocation5 + $0x1], 0 }
  0x21   :  { %45 = vsyncpa [#allocation22], 0 }
  0x22   :  { %47 = vsyncpa [#allocation22 + $0x1], 0 }
  0x23   :  { %48 = vsyncpa [#allocation25], 0 }
  0x24   :  { %50 = vsyncpa [#allocation25 + $0x1], 0  ;;  %s3423_s27 = smov 0   ;;  %s3425_s3 = smov 0  }
  0x25   :  { %s3427_s7 = smov 0   ;;  %s3429_s28 = smov 0  }
  0x26 LB: > { %3988 = sst [smem:[#allocation36_spill]] %s3261_s27  ;;  %s3447_s9 = sadd.s32 4294967295, %s3273_s28   ;;  %s3273_s28 = sphi %s3429_s28, %s4030_s28   ;;  %s3269_s7 = sphi %s3427_s7, %s4032_s7   ;;  %s3265_s3 = sphi %s3425_s3, %s4034_s3   ;;  %s3261_s27 = sphi %s3423_s27, %s4033_s27  }
  0x27   : > { %3989 = sst [smem:[#allocation37_spill]] %s3269_s7  ;;  %p2350_p0 = scmp.ge.s32.totalorder %s3273_s28, 1 }
  0x28   : > { %s3990_s29 = sld [smem:[#allocation46_spill]]  ;;  %p77_p1 = scmp.eq.s32.totalorder %s3447_s9, 0 }
  0x29   : > { %p663_p2 = scmp.lt.s32.totalorder %s3273_s28, 3  ;;  %s3275_s2 = smov [#allocation8]  }
  0x2a   : > { %s680_s5 = sshll.u32 %s3275_s2, 4  ;;  %s3992_s1 = sld [smem:[#allocation49_spill]]  ;;  %s681_s5 = int_to_ptr.vmem [resolvable:$true] %s680_s5 }
  0x2b   : > { %p3452_p3 = pnand %p2350_p0, %p663_p2  ;;  %s3277_s2 = smov 64  }
  0x2c   : > { %s3278_s25 = smov 4   ;;  %s3279_s24 = smov [#allocation12]  }
  0x2d   : > { %p2674_p5 = pneg %p3452_p3  ;;  %s723_s22 = sshll.u32 %s3279_s24, 4  ;;  %s724_s22 = int_to_ptr.vmem [resolvable:$true] %s723_s22 }
  0x2e   : > { %s678_s0 = sshll.u32 %s3990_s29, 4  ;;  %s3276_s29 = smov [#allocation9]   ;;  %s679_s0 = int_to_ptr.hbm [resolvable:$true] %s678_s0 }
  0x2f   : > { %p3464_p6 = pnand %p2674_p5, %p77_p1  ;;  %s697_s26 = sshll.u32 %s3276_s29, 4  ;;  %s698_s26 = int_to_ptr.vmem [resolvable:$true] %s697_s26 }
  0x30   : > { %s695_s8 = sshll.u32 %s3992_s1, 4  ;;  %s3994_s1 = sld [smem:[#allocation51_spill]]  ;;  %s696_s8 = int_to_ptr.hbm [resolvable:$true] %s695_s8 }
  0x31   : > { %2677 = dma.hbm_to_vmem [thread:$0]  (!%p3464_p6), %s679_s0, 16, %s681_s5, [#allocation7]  }
  0x32   : > { %2680 = dma.hbm_to_vmem [thread:$0]  (!%p3464_p6), %s696_s8, 576, %s698_s26, [#allocation10], %s3277_s2, %s3277_s2, %s3278_s25  }
  0x33   : > { %s3995_s12 = sld [smem:[#allocation54_spill]]  ;;  %s3280_s26 = smov [#allocation15]  }
  0x34   : > { %s754_s5 = sshll.u32 %s3280_s26, 4  ;;  %s3996_s6 = sld [smem:[#allocation50_spill]]  ;;  %s755_s5 = int_to_ptr.vmem [resolvable:$true] %s754_s5 }
  0x35   : > { %s3997_s11 = sld [smem:[#allocation53_spill]]  ;;  %s3282_s26 = smov [#allocation14]  }
  0x36   : > { %s721_s23 = sshll.u32 %s3994_s1, 4  ;;  %s740_s8 = sshll.u32 %s3282_s26, 4  ;;  %s722_s23 = int_to_ptr.hbm [resolvable:$true] %s721_s23  ;;  %s741_s8 = int_to_ptr.vmem [resolvable:$true] %s740_s8 }
  0x37   : > { %2686 = dma.hbm_to_vmem [thread:$0]  (!%p3464_p6), %s722_s23, 576, %s724_s22, [#allocation13], %s3277_s2, %s3277_s2, %s3278_s25  }
  0x38   : > { %s3281_s22 = smov [#allocation11]   ;;  %s3998_s13 = sld [smem:[#allocation55_spill]] }
  0x39   : > { %s752_s0 = sshll.u32 %s3995_s12, 4  ;;  %s712_s23 = sshll.u32 %s3281_s22, 4  ;;  %s753_s0 = int_to_ptr.hbm [resolvable:$true] %s752_s0  ;;  %s713_s23 = int_to_ptr.vmem [resolvable:$true] %s712_s23 }
  0x3a   : > { %s710_s1 = sshll.u32 %s3996_s6, 4  ;;  %s3999_s16 = sld [smem:[#allocation57_spill]]  ;;  %s711_s1 = int_to_ptr.hbm [resolvable:$true] %s710_s1 }
  0x3b   : > { %2692 = dma.hbm_to_vmem [thread:$0]  (!%p3464_p6), %s753_s0, 1344, %s755_s5, [#allocation16], %s3277_s2, %s3277_s2, %s3278_s25  }
  0x3c   : > { %s738_s29 = sshll.u32 %s3997_s11, 4  ;;  %s3283_s24 = smov [#allocation17]   ;;  %s739_s29 = int_to_ptr.hbm [resolvable:$true] %s738_s29 }
  0x3d   : > { %2683 = dma.hbm_to_vmem [thread:$0]  (!%p3464_p6), %s711_s1, 16, %s713_s23, [#allocation10]  }
  0x3e   : > { %s767_s0 = sshll.u32 %s3998_s13, 4  ;;  %s769_s22 = sshll.u32 %s3283_s24, 4  ;;  %s768_s0 = int_to_ptr.hbm [resolvable:$true] %s767_s0  ;;  %s770_s22 = int_to_ptr.vmem [resolvable:$true] %s769_s22 }
  0x3f   : > { %2689 = dma.hbm_to_vmem [thread:$0]  (!%p3464_p6), %s739_s29, 256, %s741_s8, [#allocation13], %s3277_s2, %s3277_s2, %s3278_s25  }
  0x40   : > { %s785_s21 = sshll.u32 %s3999_s16, 4  ;;  %s3284_s23 = smov [#allocation18]   ;;  %s786_s21 = int_to_ptr.hbm [resolvable:$true] %s785_s21 }
  0x41   : > { %2695 = dma.hbm_to_vmem [thread:$0]  (!%p3464_p6), %s768_s0, 16, %s770_s22, [#allocation16]  }
  0x42   : > { %s787_s25 = sshll.u32 %s3284_s23, 4  ;;  %s3952_s2 = sadd.s32 4294967294, %s3273_s28   ;;  %s788_s25 = int_to_ptr.vmem [resolvable:$true] %s787_s25 }
  0x43   : > { %2698 = dma.hbm_to_vmem [thread:$0]  (!%p3464_p6), %s786_s21, 16, %s788_s25, [#allocation19]  }
  0x44   : > { %s3516_s29 = sadd.s32 1, %s3273_s28   ;;  %s63_s8 = sadd.s32 1, %s3269_s7 }
  0x45   : > { %4000 = sst [smem:[#allocation38_spill]] %s3516_s29  ;;  %s60_s26 = ssub.s32 %s3273_s28, %s3516_s29 }
  0x46   : > { %p61_p7 = scmp.eq.s32.totalorder %s60_s26, 0  ;;  %p70_p8 = scmp.ne.s32.totalorder %s3269_s7, %s3265_s3 }
  0x47   : > { %p71_p9 = scmp.eq.s32.totalorder %s3273_s28, 0  ;;  %p76_p10 = scmp.ne.s32.totalorder %s3265_s3, %s3261_s27 }
  0x48   : > { %s3527_s10 = scalar_select %p61_p7, %s3269_s7, %s63_s8  }
  0x49   : > { %p3529_p11 = por %p71_p9, %p70_p8  ;;  %p3535_p12 = por %p77_p1, %p76_p10 }
  0x4a   : > { %4001 = sst [smem:[#allocation39_spill]] %s3527_s10  ;;  %p572_p13 = scmp.eq.s32.totalorder %s3447_s9, 1 }
  0x4b   : > { %p578_p0 = scmp.eq.s32.totalorder %s3952_s2, 1  ;;  %p2727_p2 = scmp.lt.s32.totalorder %s3273_s28, 2 }
  0x4c   : > { %s3544_s0 = sand.u32 1, %s3269_s7   ;;  %p3546_p5 = por %p572_p13, %p70_p8 }
  0x4d   : > { %p3550_p6 = por %p578_p0, %p76_p10  ;;  %s2360_s21 = sshll.u32 %s3544_s0, 2 }
  0x4e   : > { %s4004_s5 = scalar_select %p3546_p5, 1, 0 }
  0x4f   : > { %s4006_s1 = scalar_select %p3550_p6, 1, 0 }
  0x50   : > { %4005 = sst [smem:[#allocation40_spill]] %s4004_s5  ;;  %s2361_s24 = sshll.u32 %s3273_s28, 2 }
  0x51   : > { %4007 = sst [smem:[#allocation41_spill]] %s4006_s1  ;;  %s820_s8 = scalar_lea.vmem [#allocation3], %s2360_s21 }
  0x52   : > { %s4008_s25 = sld [smem:[#allocation42_spill]]  ;;  %s828_s2 = sshll.u32 %s820_s8, 4  ;;  %s829_s2 = int_to_ptr.vmem [resolvable:$true] %s828_s2 }
  0x53   : > { %p3561_p7 = pnand %p2727_p2, %p3529_p11  ;;  %s835_s13 = sand.u32 1, %s3273_s28  }
  0x54   : > { %s2362_s16 = sshll.u32 %s3544_s0, 1  ;;  %s817_s10 = scalar_lea.sflag [#allocation4], %s3544_s0 }
  0x55   : > { %p3035_p9 = pneg %p3561_p7 }
  0x58   : > { %s824_s26 = scalar_lea.hbm %s4008_s25, %s2361_s24  ;;  %s3038_s24 = scalar_lea.hbm %s4008_s25, 8 }
  0x59   : > { %s826_s11 = sshll.u32 %s824_s26, 4  ;;  %s827_s11 = int_to_ptr.hbm [resolvable:$true] %s826_s11 }
  0x5a   : > { %s3031_s7 = sshra.s32 %s827_s11, 4  ;;  %s3032_s7 = int_to_ptr.hbm [resolvable:$true] %s3031_s7 }
  0x5b   : > { %s3033_s29 = scalar_lea.hbm %s3032_s7, 4  ;;  %p3039_p11 = scmp.lt.s32.totalorder %s3032_s7, %s4008_s25 }
  0x5c   : > { %p3034_p8 = scmp.ne.s32.totalorder %s3032_s7, %s3033_s29  ;;  %p3040_p0 = scmp.lt.s32.totalorder %s3038_s24, %s3033_s29 }
  0x5e   : > { %p3036_p10 = pnand %p3035_p9, %p3034_p8  ;;  %p3041_p2 = por %p3040_p0, %p3039_p11 }
  0x60   : > { %p3037_p13 = pneg %p3036_p10 }
  0x62   : > { %p3042_p4 = pnand %p3041_p2, %p3037_p13 }
  0x64   : > { %3045 = shalt.err (!%p3042_p4)
}
  0x65   : > { %2702 = dma.hbm_to_vmem [thread:$0]  (!%p3561_p7), %s827_s11, 64, %s829_s2, %s817_s10  }
  0x66   : > { %s2363_s0 = sshll.u32 %s3273_s28, 1  ;;  %s4010_s1 = sld [smem:[#allocation43_spill]] }
  0x67   : > { %s839_s6 = scalar_lea.vmem [#allocation6], %s2362_s16  ;;  %s836_s7 = scalar_lea.sflag [#allocation7], %s835_s13 }
  0x68   : > { %s847_s21 = sshll.u32 %s839_s6, 4  ;;  %s848_s21 = int_to_ptr.vmem [resolvable:$true] %s847_s21 }
  0x6c   : > { %s843_s27 = scalar_lea.hbm %s4010_s1, %s2363_s0  ;;  %s3068_s10 = scalar_lea.hbm %s4010_s1, 4 }
  0x6d   : > { %s845_s5 = sshll.u32 %s843_s27, 4  ;;  %s846_s5 = int_to_ptr.hbm [resolvable:$true] %s845_s5 }
  0x6e   : > { %s3061_s29 = sshra.s32 %s846_s5, 4  ;;  %s3062_s29 = int_to_ptr.hbm [resolvable:$true] %s3061_s29 }
  0x6f   : > { %s3063_s24 = scalar_lea.hbm %s3062_s29, 2  ;;  %p3069_p13 = scmp.lt.s32.totalorder %s3062_s29, %s4010_s1 }
  0x70   : > { %p3064_p4 = scmp.ne.s32.totalorder %s3062_s29, %s3063_s24  ;;  %p3070_p11 = scmp.lt.s32.totalorder %s3068_s10, %s3063_s24 }
  0x72   : > { %p3066_p8 = pnand %p3064_p4, %p3035_p9  ;;  %p3071_p0 = por %p3070_p11, %p3069_p13 }
  0x74   : > { %p3067_p10 = pneg %p3066_p8 }
  0x76   : > { %p3072_p2 = pnand %p3071_p0, %p3067_p10 }
  0x78   : > { %3075 = shalt.err (!%p3072_p2)
}
  0x79   : > { %2705 = dma.hbm_to_vmem [thread:$0]  (!%p3561_p7), %s846_s5, 32, %s848_s21, %s836_s7  }
  0x7a   : > { %863 = sbr.rel (%p3452_p3) target bundleno = 1892 (0x764), region = 112  ;;  %s3599_s13 = sand.u32 (!%p3452_p3), 1, %s3265_s3  }
  0x7b   : > { %s3602_s16 = sshll.u32 (!%p3452_p3), %s3599_s13, 2  ;;  %s866_s27 = scalar_lea.sflag (!%p3452_p3), [#allocation4], %s3599_s13 }
  0x7c   : > { %s869_s0 = scalar_lea.vmem (!%p3452_p3), [#allocation3], %s3602_s16 }
  0x7f   : > { %3220 = dma.done.wait (%p3535_p12), %s866_s27, 64  }
  0x80   : > { %3222 = vsyncadd (%p3535_p12), %s866_s27, 4294967232  ;;  %s875_s12 = sand.u32 1, %s3447_s9   ;;  %s2366_s30 = sshll.u32 %s3599_s13, 1 }
  0x81   : > { %s876_s5 = scalar_lea.sflag [#allocation7], %s875_s12  ;;  %s3614_s26 = scalar_lea.vmem [#allocation6], %s2366_s30 }
  0x82   : > { %3224 = dma.done.wait (%p3535_p12), %s876_s5, 32  }
  0x83   : > { %3226 = vsyncadd (%p3535_p12), %s876_s5, 4294967264 }
  0x84   : > { %3228 = dma.done.wait (%p77_p1), [#allocation7], 16  }
  0x85   : > { %3230 = vsyncadd (%p77_p1), [#allocation7], 4294967280 }
  0x86   : > { %3232 = dma.done.wait (%p77_p1), [#allocation10], 592  }
  0x87   : > { %3234 = vsyncadd (%p77_p1), [#allocation10], 4294966704 }
  0x88   : > { %3236 = dma.done.wait (%p77_p1), [#allocation13], 832  }
  0x89   : > { %3238 = vsyncadd (%p77_p1), [#allocation13], 4294966464 }
  0x8a   : > { %3240 = dma.done.wait (%p77_p1), [#allocation16], 1360  }
  0x8b   : > { %3242 = vsyncadd (%p77_p1), [#allocation16], 4294965936 }
  0x8c   : > { %3244 = dma.done.wait (%p77_p1), [#allocation19], 16  }
  0x8d   : > { %3246 = vsyncadd (%p77_p1), [#allocation19], 4294967280  ;;  %vm1020_vm0 = vcmask 188416   ;;  %v3285_v0 = vmov 0.0   ;;  %vm1048_vm1 = vcmask 1043456   ;;  %s4011_s6 = sld [smem:[#allocation45_spill]] }
  0x8e   : > { %1021 = vst.msk [vmem:[#allocation2] sm:$0x1] %vm1020_vm0, %v3285_v0  ;;  %vm1023_vm2 = vcmask 195584   ;;  %v1018_v7 = vld [vmem:[%s869_s0] sm:$0xf]  ;;  %s4012_s5 = sld [smem:[#allocation48_spill]] }
  0x8f   : > { %1022 = vst.msk [vmem:[#allocation2 + $0x9] sm:$0x1] %vm1020_vm0, %v3285_v0  ;;  %v1019_v11 = vunpack.c.l.bf16 %v1018_v7  ;;  %v2782_v30 = vld [vmem:[#allocation8] ss:$0 sm:$0xff]  ;;  %s4013_s21 = sld [smem:[#allocation47_spill]]  ;;  %vm1136_vm3 = vcmask 64512  }
  0x90   : > { %vm1181_vm4 = vcmask 392192   ;;  %v1212_v44 = vld [vmem:[#allocation9 + $0x14] sm:$0xf]  ;;  %v1246_v45 = vld [vmem:[#allocation9 + $0x20] sm:$0xf]  ;;  %v2597_v56 = vld [vmem:[#allocation9 + $0xc] sm:$0xff] }
  0x91   : > { %1024 = vst.msk [vmem:[#allocation2 + $0x1] sm:$0xff] %vm1023_vm2, %v1019_v11  ;;  %v1206_v46 = vld [vmem:[#allocation9 + $0x8] sm:$0xf]  ;;  %v1218_v47 = vunpack.c.l.b16 %v1212_v44  ;;  %v1252_v48 = vunpack.c.l.b16 %v1246_v45  ;;  %v2598_v57 = vld [vmem:[#allocation9 + $0x18] sm:$0xff]  ;;  %v2596_v58 = vld [vmem:[#allocation9] sm:$0xff]  ;;  %vm1335_vm5 = vcmask 1041408  }
  0x92   : > { %v1280_v49 = vunpack.c.l.b16 %v1206_v46  ;;  %v1321_v59 = vld [vmem:[#allocation12 + $0x14] sm:$0x3]  ;;  %v2600_v63 = vld [vmem:[#allocation12 + $0xc] sm:$0xff]  ;;  %vm1481_vm6 = vcmask 450560   ;;  %vm1200_vm7 = vcmask 191488   ;;  %vm1306_vm8 = vcmask 155648  }
  0x93   : > { %v2382_v1 = vld [vmem:[%s4011_s6 + $0x14] sm:$0xf]  ;;  %v2390_v2 = vld [vmem:[%s4011_s6 + $0x20] sm:$0xf]  ;;  %v1029_v3 = vld [vmem:[%s4011_s6 + $0x8] sm:$0xf]  ;;  %v1220_v50 = vpack.c.b16 %v1218_v47, %v1218_v47  ;;  %v1254_v51 = vpack.c.b16 %v1252_v48, %v1252_v48  ;;  %v1327_v60 = vunpack.c.l.b16 %v1321_v59 }
  0x94   : > { %v1041_v4 = vunpack.c.l.b16 %v2382_v1  ;;  %v1076_v5 = vunpack.c.l.b16 %v2390_v2  ;;  %v1104_v6 = vunpack.c.l.b16 %v1029_v3  ;;  %v2591_v15 = vld [vmem:[%s4011_s6 + $0xc] sm:$0xff]  ;;  %v2592_v16 = vld [vmem:[%s4011_s6 + $0x18] sm:$0xff]  ;;  %v2590_v17 = vld [vmem:[%s4011_s6] sm:$0xff]  ;;  %v1282_v52 = vpack.c.b16 %v1280_v49, %v1280_v49  ;;  %s4014_s10 = sld [smem:[#allocation52_spill]]  ;;  %s3961_s11 = scalar_lea.vmem [#allocation20], %s3602_s16 }
  0x95   : > { %v2595_v36 = vld [vmem:[%s4012_s5 + $0x10] sm:$0xff]  ;;  %v1134_v38 = vld [vmem:[%s4013_s21] sm:$0x3]  ;;  %v2594_v39 = vld [vmem:[%s4012_s5 + $0x8] sm:$0xff]  ;;  %v1226_v53 = vsel %vm1048_vm1, %v1220_v50, 0  ;;  %v1260_v54 = vsel %vm1048_vm1, %v1254_v51, 0  ;;  %v1329_v61 = vpack.c.b16 %v1327_v60, %v1327_v60 }
  0x96   : > { %v1043_v8 = vpack.c.b16 %v1041_v4, %v1041_v4  ;;  %v1078_v9 = vpack.c.b16 %v1076_v5, %v1076_v5  ;;  %v1106_v10 = vpack.c.b16 %v1104_v6, %v1104_v6  ;;  %v2593_v40 = vld [vmem:[%s4012_s5] sm:$0xff]  ;;  %v1288_v55 = vsel %vm1048_vm1, %v1282_v52, 0  ;;  %v1315_v2 = vld [vmem:[#allocation12 + $0x8] sm:$0x3]  ;;  %s4015_s14 = sld [smem:[#allocation56_spill]]  ;;  %p1013_p1 = scmp.lt.s32.totalorder %s3447_s9, 1 }
  0x97   : > { %v1337_v62 = vsel %vm1335_vm5, %v1329_v61, 0  ;;  %v1357_v1 = vld [vmem:[#allocation12 + $0x20] sm:$0x3]  ;;  %v1391_v4 = vunpack.c.l.b16 %v1315_v2  ;;  %vm1309_vm9 = vcmask 158720   ;;  %vm1331_vm10 = vcmask 162816   ;;  %s4016_s21 = sld [smem:[#allocation44_spill]] }
  0x98   : > { %v1050_v12 = vsel %vm1048_vm1, %v1043_v8, 0  ;;  %v1084_v13 = vsel %vm1048_vm1, %v1078_v9, 0  ;;  %v1112_v14 = vsel %vm1048_vm1, %v1106_v10, 0  ;;  %v1025_v18 = vld [vmem:[#allocation2] sm:$0xff]  ;;  %v1363_v3 = vunpack.c.l.b16 %v1357_v1  ;;  %s1014_s0 = scalar_select %p1013_p1, %s3447_s9, 1 }
  0x99   : > { %1058 = vmatpush.bf16.msra.mxu0 %v1050_v12  ;;  %1092 = vmatpush.bf16.msra.mxu1 %v1084_v13  ;;  %v1030_v19 = vld [vmem:[#allocation2 + $0x1] sm:$0xff]  ;;  %1198 = vst.msk [vmem:[#allocation2] sm:$0x1] %vm1020_vm0, %v3285_v0  ;;  %v1026_v23 = vpack.c.bf16 %v1025_v18, %v1025_v18  ;;  %v1393_v6 = vpack.c.b16 %v1391_v4, %v1391_v4  ;;  %v1304_v12 = vld [vmem:[%s3614_s26] sm:$0x3]  ;;  %vm1464_vm11 = vcmask 1045504  }
  0x9a   : > { %1120 = vmatpush.bf16.msra.mxu2 %v1112_v14  ;;  %v1065_v20 = vld [vmem:[#allocation2 + $0x2] sm:$0xff]  ;;  %v1031_v21 = vpack.c.bf16 %v1030_v19, %v1030_v19  ;;  %v1365_v5 = vpack.c.b16 %v1363_v3, %v1363_v3  ;;  %v1305_v13 = vunpack.c.l.bf16 %v1304_v12  ;;  %vm1424_vm12 = vcmask 31744   ;;  %v2611_v12 = vld [vmem:[#allocation15 + $0x40] sm:$0xff]  ;;  %s2379_s30 = sshll.u32 %s1014_s0, 3  ;;  %s3960_s29 = scalar_lea.vmem [#allocation23], %s3602_s16 }
  0x9b   : > { %v1066_v22 = vpack.c.bf16 %v1065_v20, %v1065_v20  ;;  %1199 = vst.msk [vmem:[#allocation2 + $0x5] sm:$0x1] %vm1020_vm0, %v3285_v0  ;;  %v1399_v8 = vsel %vm1335_vm5, %v1393_v6, 0  ;;  %v2601_v9 = vld [vmem:[#allocation12 + $0x18] sm:$0xff]  ;;  %v2599_v10 = vld [vmem:[#allocation12] sm:$0xff]  ;;  %vm1460_vm13 = vcmask 228352  }
  0x9c   : > { %v1371_v7 = vsel %vm1335_vm5, %v1365_v5, 0  ;;  %1483 = vst.msk [vmem:[#allocation2 + $0x9] sm:$0x1] %vm1481_vm6, %v3285_v0  ;;  %v2783_v45 = vld [vmem:[#allocation11] ss:$0 sm:$0xff]  ;;  %vm1484_vm14 = vcmask 457728  }
  0x9d   : > { %1059 = vmatpush.bf16.msra.mxu0 %v2591_v15  ;;  %1093 = vmatpush.bf16.msra.mxu1 %v2592_v16  ;;  %vm1636_vm15 = vcmask 385024   ;;  %vm1815_vm0 = vcmask 523264   ;;  %s1016_s7 = scalar_lea.vmem %s4016_s21, %s2379_s30  ;;  %s4017_s23 = sld [smem:[#allocation58_spill]] }
  0x9e   : > { %1121 = vmatpush.bf16.msra.mxu2 %v2590_v17  ;;  %s4018_s30 = sld [smem:[#allocation59_spill]]  ;;  %s3833_s4 = scalar_lea.sflag [#allocation22], %s875_s12 }
  0x9f   : > { %s4020_s2 = sld [smem:[#allocation61_spill]] }
  0xa0   : > { %2387 = vmatmul.msk.bf16.vlgmr.msra.gmra.mxu0 %vm1023_vm2, %v1031_v21  ;;  %2395 = vmatmul.msk.bf16.vlgmr.msra.gmra.mxu1 %vm1023_vm2, %v1066_v22 }
  0xa1   : > { %2400 = vmatmul.msk.bf16.vlgmr.msra.gmra.mxu2 %vm1023_vm2, %v1026_v23  ;;  %1234 = vmatpush.bf16.msrb.mxu0 %v1226_v53 }
  0xa2   : > { %1268 = vmatpush.bf16.msrb.mxu1 %v1260_v54  ;;  %1296 = vmatpush.bf16.msrb.mxu2 %v1288_v55  ;;  %v1422_v54 = vld [vmem:[%s4014_s10] sm:$0xf]  ;;  %v2602_v55 = vld [vmem:[#allocation14] sm:$0xff]  ;;  %s2376_s10 = sshll.u32 %s3599_s13, 3 }
  0xa3   : > { %s3795_s22 = scalar_lea.vmem [#allocation21], %s2376_s10 }
  0xa4   : > { %s2038_s27 = sshll.u32 %s3795_s22, 4  ;;  %s2039_s27 = int_to_ptr.vmem [resolvable:$true] %s2038_s27 }
  0xa5   : > { %1235 = vmatpush.bf16.msrb.mxu0 %v2597_v56  ;;  %v1504_v56 = vld [vmem:[#allocation15 + $0x34] sm:$0xf]  ;;  %s3111_s24 = scalar_lea.hbm %s4020_s2, 16 }
  0xa6   : > { %1269 = vmatpush.bf16.msrb.mxu1 %v2598_v57  ;;  %1297 = vmatpush.bf16.msrb.mxu2 %v2596_v58  ;;  %v1554_v57 = vld [vmem:[#allocation15 + $0x50] sm:$0xf]  ;;  %v1494_v58 = vld [vmem:[#allocation15 + $0x18] sm:$0xf]  ;;  %v1518_v59 = vunpack.c.l.b16 %v1504_v56  ;;  %v2784_v56 = vld [vmem:[#allocation17] ss:$0 sm:$0xff] }
  0xa7   : > { %v1568_v60 = vunpack.c.l.b16 %v1554_v57  ;;  %v1608_v61 = vunpack.c.l.b16 %v1494_v58 }
  0xa9   : > { %1379 = vmatpush.bf16.msra.mxu0 %v1371_v7  ;;  %v1612_v1 = vpack.c.b16 %v1608_v61, %v1608_v61 }
  0xaa   : > { %1407 = vmatpush.bf16.msra.mxu1 %v1399_v8  ;;  %v2609_v8 = vld [vmem:[#allocation15 + $0x2c] sm:$0xff] }
  0xab   : > { %v1620_v4 = vsel %vm1048_vm1, %v1612_v1, 0  ;;  %v1856_v1 = vld [vmem:[%s3934_s18 + $0x18] sm:$0xff] }
  0xad   : > { %1380 = vmatpush.bf16.msra.mxu0 %v2601_v9  ;;  %v2612_v9 = vld [vmem:[#allocation15 + $0x48] sm:$0xff] }
  0xae   : > { %1408 = vmatpush.bf16.msra.mxu1 %v2599_v10  ;;  %v2606_v10 = vld [vmem:[#allocation15 + $0x10] sm:$0xff] }
 0x11d   : > { %v1061_v24 = vpop.f32.mrf.mxu0  ;;  %v1095_v25 = vpop.f32.mrf.mxu1 }
 0x124   : > { %v1123_v26 = vpop.f32.mrf.mxu2 }
 0x125   : > { %v1124_v27 = vadd.f32 %v1123_v26, %v1061_v24  ;;  %v1063_v28 = vpop.f32.mrf.mxu0  ;;  %v1097_v29 = vpop.f32.mrf.mxu1 }
 0x126   : > { %v2452_v29 = vld [vmem:[#allocation14 + $0x8] sm:$0xf] }
 0x127   : > { %v1127_v31 = vadd.f32 %v1124_v27, %v1095_v25 }
 0x129   : > { %v1132_v32 = vadd.f32 %v2782_v30, %v1127_v31  ;;  %v2603_v30 = vld [vmem:[#allocation14 + $0x8] sm:$0x30] }
 0x12a   : > { %v2453_v31 = vor.u32 %v2603_v30, %v2452_v29 }
 0x12b   : > { %v3675_v33 = vmax.f32 %v1132_v32, 0.0 }
 0x12c   : > { %v1125_v34 = vpop.f32.mrf.mxu2  ;;  %v1466_v32 = vsel %vm1464_vm11, %v2453_v31, 0 }
 0x12d   : > { %v1135_v35 = vpack.c.bf16 %v3675_v33, %v3675_v33 }
 0x12f   : > { %v1141_v37 = vsel %vm1048_vm1, %v1135_v35, 0 }
 0x130   : > { %1150 = vmatpush.bf16.msra.mxu3 %v1141_v37 }
 0x133   : > { %2401 = vmatmul.msk.bf16.vlgmr.msra.gmra.mxu3 %vm1136_vm3, %v1134_v38 }
 0x134   : > { %1190 = vmatpush.bf16.msrb.mxu3 %v2595_v36 }
 0x138   : > { %1191 = vmatpush.bf16.msrb.mxu3 %v2594_v39 }
 0x13c   : > { %1192 = vmatpush.bf16.msrb.mxu3 %v2593_v40 }
 0x140   : > { %1345 = vmatpush.bf16.msra.mxu3 %v1337_v62  ;;  %v1522_v62 = vpack.c.b16 %v1518_v59, %v1518_v59 }
 0x142   : > { %v1530_v2 = vsel %vm1048_vm1, %v1522_v62, 0 }
 0x144   : > { %1346 = vmatpush.bf16.msra.mxu3 %v2600_v63  ;;  %v1572_v63 = vpack.c.b16 %v1568_v60, %v1568_v60 }
 0x146   : > { %v1580_v3 = vsel %vm1048_vm1, %v1572_v63, 0 }
 0x1b6   : > { %v1152_v41 = vpop.f32.mrf.mxu3 }
 0x1b7   : > { %v1156_v42 = vpack.c.bf16 %v1152_v41, %v1152_v41 }
 0x1b9   : > { %2414 = vmatmul.msk.bf16.vlgmr.msrb.gmra.mxu3 %vm1181_vm4, %v1156_v42 }
 0x1ba   : > { %1474 = vmatpush.bf16.msrb.mxu3 %v1466_v32 }
 0x1be   : > { %v1154_v43 = vpop.f32.mrf.mxu3  ;;  %1475 = vmatpush.bf16.msrb.mxu3 %v2602_v55 }
 0x23c   : > { %v1194_v11 = vpop.f32.mrf.mxu3 }
 0x23d   : > { %1201 = vst.msk [vmem:[#allocation2 + $0x1] sm:$0xf] %vm1200_vm7, %v1194_v11  ;;  %v2608_v11 = vld [vmem:[#allocation15 + $0x24] sm:$0xff]  ;;  %vm1846_vm7 = vcmask 261120  }
 0x244   : > { %v1196_v14 = vpop.f32.mrf.mxu3  ;;  %v1207_v15 = vld [vmem:[#allocation2 + $0x1] sm:$0xf] }
 0x245   : > { %v1241_v16 = vld [vmem:[#allocation2 + $0x2] sm:$0xf]  ;;  %v1208_v18 = vpack.c.bf16 %v1207_v15, %v1207_v15  ;;  %v2607_v14 = vld [vmem:[#allocation15 + $0x1c] sm:$0xff] }
 0x246   : > { %v1202_v17 = vld [vmem:[#allocation2] sm:$0xf]  ;;  %v1242_v19 = vpack.c.bf16 %v1241_v16, %v1241_v16  ;;  %1308 = vst.msk [vmem:[#allocation2 + $0x5] sm:$0x1] %vm1306_vm8, %v3285_v0  ;;  %v2610_v15 = vld [vmem:[#allocation15 + $0x38] sm:$0xff]  ;;  %v2604_v16 = vld [vmem:[#allocation15] sm:$0xff] }
 0x247   : > { %v1203_v20 = vpack.c.bf16 %v1202_v17, %v1202_v17  ;;  %1307 = vst.msk [vmem:[#allocation2] sm:$0x1] %vm1306_vm8, %v3285_v0  ;;  %2419 = vmatmul.msk.bf16.vlgmr.msrb.gmra.mxu0 %vm1023_vm2, %v1208_v18  ;;  %v2618_v17 = vld [vmem:[%s4015_s14 + $0x28] sm:$0xff]  ;;  %v2617_v18 = vld [vmem:[%s4015_s14 + $0x20] sm:$0xff]  ;;  %vm1916_vm8 = vcmask 130048  }
 0x248   : > { %2424 = vmatmul.msk.bf16.vlgmr.msrb.gmra.mxu1 %vm1023_vm2, %v1242_v19  ;;  %1310 = vst.msk [vmem:[#allocation2 + $0x1] sm:$0xf] %vm1309_vm9, %v1305_v13  ;;  %1536 = vmatpush.bf16.msrb.mxu0 %v1530_v2  ;;  %v2605_v13 = vld [vmem:[#allocation15 + $0x8] sm:$0xff]  ;;  %v1855_v2 = vld [vmem:[%s3934_s18 + $0x10] sm:$0xff]  ;;  %vm1902_vm9 = vcmask 125952  }
 0x249   : > { %2429 = vmatmul.msk.bf16.vlgmr.msrb.gmra.mxu2 %vm1023_vm2, %v1203_v20  ;;  %1586 = vmatpush.bf16.msrb.mxu1 %v1580_v3  ;;  %v2621_v19 = vld [vmem:[%s4015_s14 + $0x40] sm:$0xff]  ;;  %v2615_v20 = vld [vmem:[%s4015_s14 + $0x10] sm:$0xff]  ;;  %v1854_v3 = vld [vmem:[%s3934_s18 + $0x8] sm:$0xff] }
 0x24c   : > { %1537 = vmatpush.bf16.msrb.mxu0 %v2609_v8 }
 0x24d   : > { %1587 = vmatpush.bf16.msrb.mxu1 %v2612_v9  ;;  %v1850_v9 = vld [vmem:[%s3933_s17 + $0x8] sm:$0xff] }
 0x24f   : > { %v1316_v21 = vld [vmem:[#allocation2 + $0x1] sm:$0xf] }
 0x250   : > { %v1311_v22 = vld [vmem:[#allocation2] sm:$0xf]  ;;  %v1317_v23 = vpack.c.bf16 %v1316_v21, %v1316_v21  ;;  %1538 = vmatpush.bf16.msrb.mxu0 %v2608_v11  ;;  %v2616_v21 = vld [vmem:[%s4015_s14 + $0x18] sm:$0xff] }
 0x251   : > { %1482 = vst.msk [vmem:[#allocation2] sm:$0x1] %vm1481_vm6, %v3285_v0  ;;  %v1352_v24 = vld [vmem:[#allocation2 + $0x2] sm:$0xf]  ;;  %v1312_v26 = vpack.c.bf16 %v1311_v22, %v1311_v22  ;;  %1588 = vmatpush.bf16.msrb.mxu1 %v2611_v12  ;;  %v2620_v22 = vld [vmem:[%s4015_s14 + $0x38] sm:$0xff] }
 0x252   : > { %2434 = vmatmul.msk.bf16.vlgmr.msra.gmra.mxu3 %vm1331_vm10, %v1317_v23  ;;  %v1353_v25 = vpack.c.bf16 %v1352_v24, %v1352_v24  ;;  %v2614_v23 = vld [vmem:[%s4015_s14 + $0x8] sm:$0xff]  ;;  %v2619_v24 = vld [vmem:[%s4015_s14 + $0x30] sm:$0xff]  ;;  %v1849_v11 = vld [vmem:[%s3933_s17] sm:$0xff] }
 0x253   : > { %1683 = vmatpush.bf16.msra.mxu3 %v2618_v17 }
 0x254   : > { %1539 = vmatpush.bf16.msrb.mxu0 %v2607_v14 }
 0x255   : > { %1589 = vmatpush.bf16.msrb.mxu1 %v2610_v15 }
 0x257   : > { %2439 = vmatmul.msk.bf16.vlgmr.msra.gmra.mxu0 %vm1331_vm10, %v1353_v25  ;;  %1684 = vmatpush.bf16.msra.mxu3 %v2617_v18  ;;  %v2613_v25 = vld [vmem:[%s4015_s14] sm:$0xff] }
 0x258   : > { %2444 = vmatmul.msk.bf16.vlgmr.msra.gmra.mxu1 %vm1331_vm10, %v1312_v26  ;;  %1726 = vmatpush.bf16.msra.mxu0 %v2621_v19 }
 0x259   : > { %1760 = vmatpush.bf16.msra.mxu1 %v2615_v20 }
 0x25b   : > { %1685 = vmatpush.bf16.msra.mxu3 %v2616_v21 }
 0x25c   : > { %1727 = vmatpush.bf16.msra.mxu0 %v2620_v22 }
 0x25d   : > { %1761 = vmatpush.bf16.msra.mxu1 %v2614_v23 }
 0x260   : > { %1728 = vmatpush.bf16.msra.mxu0 %v2619_v24 }
 0x261   : > { %1762 = vmatpush.bf16.msra.mxu1 %v2613_v25 }
 0x2c4   : > { %v1237_v27 = vpop.f32.mrf.mxu0 }
 0x2c5   : > { %v1271_v28 = vpop.f32.mrf.mxu1 }
 0x2cc   : > { %v1299_v34 = vpop.f32.mrf.mxu2  ;;  %v1239_v35 = vpop.f32.mrf.mxu0 }
 0x2cd   : > { %v1273_v36 = vpop.f32.mrf.mxu1  ;;  %v1300_v38 = vadd.f32 %v1299_v34, %v1237_v27 }
 0x2cf   : > { %v1303_v43 = vadd.f32 %v1300_v38, %v1271_v28 }
 0x2d4   : > { %v1301_v37 = vpop.f32.mrf.mxu2  ;;  %v1382_v40 = vpop.f32.mrf.mxu0 }
 0x2d5   : > { %v1348_v39 = vpop.f32.mrf.mxu3  ;;  %v1410_v41 = vpop.f32.mrf.mxu1 }
 0x2d6   : > { %v1411_v42 = vadd.f32 %v1410_v41, %v1348_v39  ;;  %v2623_v41 = vld [vmem:[%s3931_s15 + $0x8] sm:$0xff] }
 0x2d8   : > { %v1414_v44 = vadd.f32 %v1411_v42, %v1382_v40  ;;  %v2622_v42 = vld [vmem:[%s3931_s15] sm:$0xff] }
 0x2da   : > { %v1415_v46 = vadd.f32 %v1414_v44, %v1303_v43 }
 0x2dc   : > { %v1384_v48 = vpop.f32.mrf.mxu0  ;;  %v1420_v49 = vadd.f32 %v2783_v45, %v1415_v46 }
 0x2dd   : > { %v1350_v47 = vpop.f32.mrf.mxu3  ;;  %v1412_v50 = vpop.f32.mrf.mxu1 }
 0x2de   : > { %v1421_v51 = vmax.f32 %v1420_v49, 0.0 }
 0x2e0   : > { %v1423_v52 = vpack.c.bf16 %v1421_v51, %v1421_v51 }
 0x2e2   : > { %v1429_v53 = vsel %vm1335_vm5, %v1423_v52, 0  ;;  %vm1777_vm5 = vcmask 519168  }
 0x2e3   : > { %1438 = vmatpush.bf16.msra.mxu2 %v1429_v53 }
 0x2e6   : > { %2445 = vmatmul.msk.bf16.vlgmr.msra.gmra.mxu2 %vm1424_vm12, %v1422_v54 }
 0x2e7   : > { %1626 = vmatpush.bf16.msrb.mxu2 %v1620_v4  ;;  %v2785_v4 = vld [vmem:[#allocation18] ss:$0 sm:$0xff] }
 0x2eb   : > { %1627 = vmatpush.bf16.msrb.mxu2 %v2606_v10 }
 0x2ef   : > { %1628 = vmatpush.bf16.msrb.mxu2 %v2605_v13 }
 0x2f3   : > { %1629 = vmatpush.bf16.msrb.mxu2 %v2604_v16  ;;  %v1832_v16 = vlaneseq }
 0x2f5   : > { %v1833_v19 = vand.u32 127, %v1832_v16 }
 0x2f7   : > { %v1843_v20 = vand.u32 3, %v1833_v19 }
 0x2f9   : > { %vm1844_vm6 = vcmp.ge.s32.totalorder %v1843_v20, 2 }
 0x369   : > { %v1440_v5 = vpop.f32.mrf.mxu2 }
 0x36a   : > { %v1444_v6 = vpack.c.bf16 %v1440_v5, %v1440_v5  ;;  %v1853_v5 = vld [vmem:[%s3934_s18] sm:$0xff] }
 0x36c   : > { %2454 = vmatmul.msk.bf16.vlgmr.msrb.gmra.mxu3 %vm1460_vm13, %v1444_v6  ;;  %v1852_v6 = vld [vmem:[%s3933_s17 + $0x18] sm:$0xff] }
 0x371   : > { %v1442_v7 = vpop.f32.mrf.mxu2 }
 0x372   : > { %v1851_v7 = vld [vmem:[%s3933_s17 + $0x10] sm:$0xff] }
 0x3ef   : > { %v1477_v26 = vpop.f32.mrf.mxu3 }
 0x3f0   : > { %1485 = vst.msk [vmem:[#allocation2 + $0x1] sm:$0xff] %vm1484_vm14, %v1477_v26  ;;  %v2626_v26 = vld [vmem:[%s3935_s19] sm:$0xff] }
 0x3f7   : > { %v1479_v27 = vpop.f32.mrf.mxu3  ;;  %v1495_v28 = vld [vmem:[#allocation2 + $0x1] sm:$0xff] }
 0x3f8   : > { %v1545_v29 = vld [vmem:[#allocation2 + $0x2] sm:$0xff]  ;;  %v1496_v31 = vpack.c.bf16 %v1495_v28, %v1495_v28 }
 0x3f9   : > { %v1486_v30 = vld [vmem:[#allocation2] sm:$0xff]  ;;  %v1546_v32 = vpack.c.bf16 %v1545_v29, %v1545_v29  ;;  %1638 = vst.msk [vmem:[#allocation2 + $0x9] sm:$0x1] %vm1636_vm15, %v3285_v0 }
 0x3fa   : > { %v1487_v34 = vpack.c.bf16 %v1486_v30, %v1486_v30  ;;  %1637 = vst.msk [vmem:[#allocation2] sm:$0x1] %vm1636_vm15, %v3285_v0  ;;  %2467 = vmatmul.msk.bf16.vlgmr.msrb.gmra.mxu0 %vm1484_vm14, %v1496_v31  ;;  %v2625_v0 = vld [vmem:[%s3931_s15 + $0x18] sm:$0xff]  ;;  %v1848_v28 = vld [vmem:[%s1016_s7] sm:$0xff]  ;;  %s2584_s7 = sshll.u32 %s3447_s9, 3 }
 0x3fb   : > { %2480 = vmatmul.msk.bf16.vlgmr.msrb.gmra.mxu1 %vm1484_vm14, %v1546_v32  ;;  %1639 = vst.msk [vmem:[#allocation2 + $0x1] sm:$0xff] %vm1181_vm4, %v3675_v33  ;;  %1823 = vmatpush.bf16.msra.mxu2 %v2625_v0  ;;  %v2624_v33 = vld [vmem:[%s3931_s15 + $0x10] sm:$0xff]  ;;  %v1964_v0 = vld [vmem:[%s4018_s30 + $0x8] sm:$0xf]  ;;  %s2036_s10 = scalar_lea.hbm %s4020_s2, %s2584_s7 }
 0x3fc   : > { %2493 = vmatmul.msk.bf16.vlgmr.msrb.gmra.mxu2 %vm1484_vm14, %v1487_v34  ;;  %1872 = vmatpush.msrb.mxu0 %v1856_v1  ;;  %v2786_v34 = vld [vmem:[%s3936_s20] ss:$0 sm:$0xff]  ;;  %s2040_s0 = sshll.u32 %s2036_s10, 4  ;;  %s2041_s0 = int_to_ptr.hbm [resolvable:$true] %s2040_s0 }
 0x3fd   : > { %1927 = vmatpush.bf16.msrb.mxu1 %v2626_v26  ;;  %s3105_s8 = sshra.s32 %s2041_s0, 4  ;;  %s3106_s8 = int_to_ptr.hbm [resolvable:$true] %s3105_s8 }
 0x3fe   : > { %1873 = vmatpush.msrb.mxu0 %v1855_v2  ;;  %p3112_p9 = scmp.lt.s32.totalorder %s3106_s8, %s4020_s2 }
 0x3ff   : > { %1824 = vmatpush.bf16.msra.mxu2 %v2624_v33  ;;  %v1970_v33 = vunpack.c.l.b16 %v1964_v0 }
 0x400   : > { %1874 = vmatpush.msrb.mxu0 %v1854_v3 }
 0x402   : > { %v1648_v35 = vld [vmem:[#allocation2 + $0x1] sm:$0xff]  ;;  %1875 = vmatpush.msrb.mxu0 %v1853_v5 }
 0x403   : > { %v1649_v36 = vpack.c.bf16 %v1648_v35, %v1648_v35  ;;  %v1691_v37 = vld [vmem:[#allocation2 + $0x2] sm:$0xff]  ;;  %1825 = vmatpush.bf16.msra.mxu2 %v2623_v41  ;;  %v1972_v41 = vpack.c.b16 %v1970_v33, %v1970_v33 }
 0x404   : > { %v1640_v38 = vld [vmem:[#allocation2] sm:$0xff]  ;;  %v1692_v39 = vpack.c.bf16 %v1691_v37, %v1691_v37 }
 0x405   : > { %2512 = vmatmul.msk.bf16.vlgmr.msra.gmra.mxu3 %vm1181_vm4, %v1649_v36  ;;  %v1641_v40 = vpack.c.bf16 %v1640_v38, %v1640_v38 }
 0x407   : > { %1826 = vmatpush.bf16.msra.mxu2 %v2622_v42  ;;  %v1978_v42 = vsel %vm1048_vm1, %v1972_v41, 0 }
 0x408   : > { %1986 = vmatpush.bf16.msrb.mxu3 %v1978_v42 }
 0x40a   : > { %2531 = vmatmul.msk.bf16.vlgmr.msra.gmra.mxu0 %vm1181_vm4, %v1692_v39  ;;  %v2627_v39 = vld [vmem:[%s4017_s23] sm:$0xff]  ;;  %s2583_s23 = sshll.u32 %s3447_s9, 2 }
 0x40b   : > { %2544 = vmatmul.msk.bf16.vlgmr.msra.gmra.mxu1 %vm1181_vm4, %v1641_v40  ;;  %1893 = vmatpush.msra.mxu0 %v1852_v6 }
 0x40d   : > { %1894 = vmatpush.msra.mxu0 %v1851_v7 }
 0x40f   : > { %1895 = vmatpush.msra.mxu0 %v1850_v9 }
 0x411   : > { %1896 = vmatpush.msra.mxu0 %v1849_v11 }
 0x477   : > { %v1541_v43 = vpop.f32.mrf.mxu0 }
 0x478   : > { %v1591_v44 = vpop.f32.mrf.mxu1 }
 0x47f   : > { %v1631_v45 = vpop.f32.mrf.mxu2  ;;  %v1543_v46 = vpop.f32.mrf.mxu0 }
 0x480   : > { %v1593_v47 = vpop.f32.mrf.mxu1  ;;  %v1632_v49 = vadd.f32 %v1631_v45, %v1541_v43  ;;  %v2628_v43 = vld [vmem:[%s4018_s30] sm:$0xff] }
 0x481   : > { %1987 = vmatpush.bf16.msrb.mxu3 %v2628_v43 }
 0x482   : > { %v1635_v54 = vadd.f32 %v1632_v49, %v1591_v44 }
 0x487   : > { %v1633_v48 = vpop.f32.mrf.mxu2  ;;  %v1730_v51 = vpop.f32.mrf.mxu0 }
 0x488   : > { %v1687_v50 = vpop.f32.mrf.mxu3  ;;  %v1764_v52 = vpop.f32.mrf.mxu1 }
 0x489   : > { %v1765_v53 = vadd.f32 %v1764_v52, %v1687_v50 }
 0x48b   : > { %v1768_v55 = vadd.f32 %v1765_v53, %v1730_v51 }
 0x48d   : > { %v1769_v57 = vadd.f32 %v1768_v55, %v1635_v54 }
 0x48f   : > { %v1774_v58 = vadd.f32 %v2784_v56, %v1769_v57  ;;  %v1732_v60 = vpop.f32.mrf.mxu0 }
 0x490   : > { %v1689_v59 = vpop.f32.mrf.mxu3  ;;  %v1766_v61 = vpop.f32.mrf.mxu1 }
 0x491   : > { %v1775_v62 = vmax.f32 %v1774_v58, 0.0 }
 0x493   : > { %v1776_v63 = vpack.c.bf16 %v1775_v62, %v1775_v62 }
 0x495   : > { %2561 = vmatmul.msk.bf16.vlgmr.msra.gmra.mxu2 %vm1815_vm0, %v1776_v63  ;;  %1778 = vst.msk [vmem:[%s3961_s11] sm:$0xf] %vm1777_vm5, %v1776_v63 }
 0x518   : > { %v1828_v8 = vpop.f32.mrf.mxu2 }
 0x519   : > { %v1829_v10 = vadd.f32 %v2785_v4, %v1828_v8 }
 0x51b   : > { %v1834_v12 = vand.u32 2147483647, %v1829_v10  ;;  %v1841_v23 = vmax.f32 %v1829_v10, 0.0 }
 0x51d   : > { %v1835_v13 = vsub.f32 0.0, %v1834_v12 }
 0x51f   : > { %v1836_v14 = vmul.f32 1.442695, %v1835_v13 }
 0x520   : > { %v1830_v15 = vpop.f32.mrf.mxu2 }
 0x521   : > { %2787 = vpow2.f32 %v1836_v14 }
 0x527   : > { %v2788_v17 = vpop.eup %2787 }
 0x528   : > { %v1838_v18 = vadd.f32 1.0, %v2788_v17 }
 0x52a   : > { %2789 = vlog2.f32 %v1838_v18 }
 0x530   : > { %v2790_v21 = vpop.eup %2789 }
 0x531   : > { %v1840_v22 = vmul.f32 0.6931472, %v2790_v21 }
 0x533   : > { %v1842_v24 = vadd.f32 %v1841_v23, %v1840_v22 }
 0x535   : > { %v1845_v25 = vsel %vm1844_vm6, %v1842_v24, %v1829_v10 }
 0x536   : > { %2562 = vmatmul.msk.f32.vlgmr.msrb.gmra.mxu0 %vm1846_vm7, %v1845_v25  ;;  %1847 = vst.msk [vmem:[%s3795_s22] sm:$0xff] %vm1846_vm7, %v1845_v25 }
 0x53e   : > { %2563 = vmatmul.msk.f32.vlgmr.msra.gmra.mxu0 %vm1846_vm7, %v1845_v25 }
 0x5b3   : > { %v1877_v27 = vpop.f32.mrf.mxu0 }
 0x5b4   : > { %v1880_v29 = vmul.f32 %v1877_v27, %v1848_v28 }
 0x5bb   : > { %v1898_v30 = vpop.f32.mrf.mxu0 }
 0x5bc   : > { %v1899_v31 = vadd.f32 %v1898_v30, %v1880_v29 }
 0x5be   : > { %v1901_v32 = vpack.c.bf16 %v1899_v31, %v1899_v31 }
 0x5c0   : > { %2568 = vmatmul.msk.bf16.vlgmr.msrb.gmra.mxu1 %vm1916_vm8, %v1901_v32  ;;  %1903 = vst.msk [vmem:[%s3960_s29] sm:$0xf] %vm1902_vm9, %v1901_v32  ;;  %s3107_s29 = scalar_lea.hbm %s3106_s8, 8 }
 0x5c1   : > { %p3108_p3 = scmp.ne.s32.totalorder %s3106_s8, %s3107_s29  ;;  %p3113_p4 = scmp.lt.s32.totalorder %s3111_s24, %s3107_s29 }
 0x5c3   : > { %p3109_p12 = pnand %p3108_p3, %p3546_p5  ;;  %p3114_p8 = por %p3113_p4, %p3112_p9 }
 0x5c5   : > { %p3110_p7 = pneg %p3109_p12 }
 0x5c7   : > { %p3115_p10 = pnand %p3114_p8, %p3110_p7 }
 0x63d   : > { %v1929_v35 = vpop.f32.mrf.mxu1 }
 0x63e   : > { %v1930_v36 = vadd.f32 %v2786_v34, %v1929_v35 }
 0x640   : > { %v1935_v37 = vpack.c.bf16 %v1930_v36, %v1930_v36 }
 0x642   : > { %v1945_v38 = vsel %vm1048_vm1, %v1935_v37, 0 }
 0x643   : > { %1954 = vmatpush.bf16.msrb.mxu2 %v1945_v38 }
 0x645   : > { %v1931_v40 = vpop.f32.mrf.mxu1 }
 0x646   : > { %2573 = vmatmul.msk.bf16.vlgmr.msrb.gmra.mxu2 %vm1136_vm3, %v2627_v39 }
 0x6c9   : > { %v1956_v44 = vpop.f32.mrf.mxu2 }
 0x6d1   : > { %v1958_v45 = vpop.f32.mrf.mxu2 }
 0x6d2   : > { %v1961_v46 = vpack.c.bf16 %v1958_v45, %v1956_v44 }
 0x6d4   : > { %2578 = vmatmul.msk.bf16.vlgmr.msrb.gmra.mxu3 %vm1023_vm2, %v1961_v46 }
 0x6d5   : > { %3118 = shalt.err (!%p3115_p10)
}
 0x6d6   : > { %2667 = dma.vmem_to_hbm [thread:$0]  (%p3546_p5), %s2039_s27, 128, %s2041_s0, %s3833_s4  }
 0x6d7   : > { %s4021_s10 = sld [smem:[#allocation60_spill]]  ;;  %s4022_s11 = scalar_lea.vmem [#allocation20], %s3602_s16 }
 0x6d8   : > { %s2024_s5 = sshll.u32 %s4022_s11, 4  ;;  %s4023_s24 = sld [smem:[#allocation62_spill]]  ;;  %s2025_s5 = int_to_ptr.vmem [resolvable:$true] %s2024_s5 }
 0x6d9   : > { %s1997_s2 = scalar_lea.sflag [#allocation5], %s3599_s13 }
 0x6dd   : > { %s2022_s1 = scalar_lea.hbm %s4021_s10, %s2583_s23  ;;  %s3139_s12 = scalar_lea.hbm %s4021_s10, 8 }
 0x6de   : > { %s2026_s7 = sshll.u32 %s2022_s1, 4  ;;  %s2050_s26 = scalar_lea.hbm %s4023_s24, %s2583_s23  ;;  %s2027_s7 = int_to_ptr.hbm [resolvable:$true] %s2026_s7 }
 0x6df   : > { %s3133_s6 = sshra.s32 %s2027_s7, 4  ;;  %s3134_s6 = int_to_ptr.hbm [resolvable:$true] %s3133_s6 }
 0x6e0   : > { %s3135_s14 = scalar_lea.hbm %s3134_s6, 4  ;;  %p3140_p2 = scmp.lt.s32.totalorder %s3134_s6, %s4021_s10 }
 0x6e1   : > { %p3136_p13 = scmp.ne.s32.totalorder %s3134_s6, %s3135_s14  ;;  %p3141_p1 = scmp.lt.s32.totalorder %s3139_s12, %s3135_s14 }
 0x6e3   : > { %p3137_p11 = pnand %p3136_p13, %p3546_p5  ;;  %p3142_p3 = por %p3141_p1, %p3140_p2 }
 0x6e5   : > { %p3138_p0 = pneg %p3137_p11 }
 0x6e7   : > { %p3143_p12 = pnand %p3142_p3, %p3138_p0 }
 0x6e9   : > { %3146 = shalt.err (!%p3143_p12)
}
 0x6ea   : > { %2666 = dma.vmem_to_hbm [thread:$0]  (%p3546_p5), %s2025_s5, 64, %s2027_s7, %s1997_s2  }
 0x6eb   : > { %s2054_s23 = sshll.u32 %s2050_s26, 4  ;;  %s4024_s1 = scalar_lea.vmem [#allocation23], %s3602_s16  ;;  %s2055_s23 = int_to_ptr.hbm [resolvable:$true] %s2054_s23 }
 0x6ec   : > { %s2052_s29 = sshll.u32 %s4024_s1, 4  ;;  %s3161_s8 = sshra.s32 %s2055_s23, 4  ;;  %s2053_s29 = int_to_ptr.vmem [resolvable:$true] %s2052_s29  ;;  %s3162_s8 = int_to_ptr.hbm [resolvable:$true] %s3161_s8 }
 0x6ed   : > { %s3163_s27 = scalar_lea.hbm %s3162_s8, 4  ;;  %s3167_s0 = scalar_lea.hbm %s4023_s24, 8 }
 0x6ee   : > { %p3164_p7 = scmp.ne.s32.totalorder %s3162_s8, %s3163_s27  ;;  %p3168_p8 = scmp.lt.s32.totalorder %s3162_s8, %s4023_s24 }
 0x6ef   : > { %p3169_p10 = scmp.lt.s32.totalorder %s3167_s0, %s3163_s27 }
 0x6f0   : > { %p3165_p9 = pnand %p3164_p7, %p3546_p5 }
 0x6f1   : > { %p3170_p13 = por %p3169_p10, %p3168_p8 }
 0x6f2   : > { %p3166_p4 = pneg %p3165_p9 }
 0x6f4   : > { %p3171_p11 = pnand %p3170_p13, %p3166_p4 }
 0x6f6   : > { %3174 = shalt.err (!%p3171_p11)
}
 0x6f7   : > { %2668 = dma.vmem_to_hbm [thread:$0]  (%p3546_p5), %s2053_s29, 64, %s2055_s23, %s3833_s4  }
 0x6f8   : > { %s2378_s16 = sshll.u32 %s3599_s13, 4  ;;  %s2629_s5 = sshll.u32 %s3447_s9, 4 }
 0x6f9   : > { %s1012_s2 = scalar_lea.vmem [#allocation24], %s2378_s16  ;;  %s4025_s11 = sld [smem:[#allocation63_spill]] }
 0x6fa   : > { %s2066_s8 = sshll.u32 %s1012_s2, 4  ;;  %s2012_s14 = scalar_lea.sflag [#allocation25], %s3599_s13  ;;  %s2067_s8 = int_to_ptr.vmem [resolvable:$true] %s2066_s8 }
 0x6ff   : > { %s2065_s1 = scalar_lea.hbm %s4025_s11, %s2629_s5  ;;  %s3195_s6 = scalar_lea.hbm %s4025_s11, 32 }
 0x700   : > { %s2068_s27 = sshll.u32 %s2065_s1, 4  ;;  %s2069_s27 = int_to_ptr.hbm [resolvable:$true] %s2068_s27 }
 0x701   : > { %s3189_s4 = sshra.s32 %s2069_s27, 4  ;;  %s3190_s4 = int_to_ptr.hbm [resolvable:$true] %s3189_s4 }
 0x702   : > { %s3191_s9 = scalar_lea.hbm %s3190_s4, 16  ;;  %p3196_p3 = scmp.lt.s32.totalorder %s3190_s4, %s4025_s11 }
 0x703   : > { %p3192_p0 = scmp.ne.s32.totalorder %s3190_s4, %s3191_s9  ;;  %p3197_p12 = scmp.lt.s32.totalorder %s3195_s6, %s3191_s9 }
 0x705   : > { %p3193_p2 = pnand %p3192_p0, %p3546_p5  ;;  %p3198_p7 = por %p3197_p12, %p3196_p3 }
 0x707   : > { %p3194_p1 = pneg %p3193_p2 }
 0x709   : > { %p3199_p9 = pnand %p3198_p7, %p3194_p1 }
 0x757   : > { %v1989_v47 = vpop.f32.mrf.mxu3 }
 0x758   : > { %1994 = vst.msk [vmem:[%s1012_s2] sm:$0xff] %vm1181_vm4, %v1989_v47 }
 0x75f   : > { %v1991_v48 = vpop.f32.mrf.mxu3 }
 0x760   : > { %1995 = vst.msk [vmem:[%s1012_s2 + $0x8] sm:$0xff] %vm1181_vm4, %v1991_v48 }
 0x761   : > { %3202 = shalt.err (!%p3199_p9)
}
 0x762   : > { %s3286_s13 = smov 128   ;;  %s3287_s22 = smov 8  }
 0x763   : > { %2669 = dma.vmem_to_hbm [thread:$0]  (%p3546_p5), %s2067_s8, 256, %s2069_s27, %s2012_s14, %s3286_s13, %s3286_s13, %s3287_s22  }
 0x764 PF: > { %s4026_s16 = sld [smem:[#allocation36_spill]]  ;;  %p4028_p4 = scmp.ge.s32.totalorder %s3273_s28, 2 }
 0x766   : > { %p2707_p8 = pnand %p4028_p4, %p3550_p6 }
 0x768   : > { %p2708_p10 = pneg %p2707_p8 }
 0x76a   : > { %s2083_s2 = sand.u32 1, %s4026_s16  }
 0x76b   : > { %s2084_s7 = scalar_lea.sflag [#allocation5], %s2083_s2 }
 0x76c   : > { %3248 = dma.done.wait (%p2708_p10), %s2084_s7, 64  }
 0x76d   : > { %3250 = vsyncadd (%p2708_p10), %s2084_s7, 4294967232  ;;  %s4029_s26 = sadd.s32 4294967294, %s3273_s28  }
 0x76e   : > { %s2093_s1 = sand.u32 1, %s4029_s26  }
 0x76f   : > { %s2094_s4 = scalar_lea.sflag [#allocation22], %s2093_s1 }
 0x770   : > { %3252 = dma.done.wait (%p2708_p10), %s2094_s4, 192  }
 0x771   : > { %3254 = vsyncadd (%p2708_p10), %s2094_s4, 4294967104  ;;  %s2114_s21 = scalar_lea.sflag [#allocation25], %s2083_s2 }
 0x772   : > { %3256 = dma.done.wait (%p2708_p10), %s2114_s21, 256  }
 0x773   : > { %3258 = vsyncadd (%p2708_p10), %s2114_s21, 4294967040  ;;  %s4030_s28 = sld [smem:[#allocation38_spill]]  ;;  %s4033_s27 = smov %s3265_s3 }
 0x774   : > { %s4031_s8 = sld [smem:[#allocation37_spill]] }
 0x775   : > { %s4032_s7 = sld [smem:[#allocation39_spill]] }
 0x779   : > { %p53_p5 = scmp.ge.s32.totalorder %s4030_s28, 4  }
 0x77a   : > { %s4034_s3 = smov %s4031_s8 }
 0x77b   :  { %55 = sbr.rel (!%p53_p5) target bundleno = 38 (0x26), region = 264 }
 0x780   :  { %2120 = vsyncpa [#allocation4], 1 }
 0x781   :  { %2122 = vsyncpa [#allocation4 + $0x1], 1 }
 0x782   :  { %2123 = vsyncpa [#allocation7], 1 }
 0x783   :  { %2125 = vsyncpa [#allocation7 + $0x1], 1 }
 0x784   :  { %2126 = vsyncpa [#allocation10], 1 }
 0x785   :  { %2127 = vsyncpa [#allocation13], 1 }
 0x786   :  { %2128 = vsyncpa [#allocation16], 1 }
 0x787   :  { %2129 = vsyncpa [#allocation19], 1 }
 0x788   :  { %2130 = vsyncpa [#allocation5], 1 }
 0x789   :  { %2132 = vsyncpa [#allocation5 + $0x1], 1 }
 0x78a   :  { %2133 = vsyncpa [#allocation22], 1 }
 0x78b   :  { %2135 = vsyncpa [#allocation22 + $0x1], 1 }
 0x78c   :  { %2136 = vsyncpa [#allocation25], 1 }
 0x78d   :  { %2138 = vsyncpa [#allocation25 + $0x1], 1 }

</bundles_post_ra>
